<compile_context>
chip_gen: v6e
topology: v6e:2x2x1
jax: 0.10.0
libtpu: 0.0.40
codegen_flags: <defaults>
</compile_context>

<pallas_src>
import functools

import jax
import jax.numpy as jnp
from jax.experimental import pallas as pl
from jax.experimental.pallas import tpu as pltpu

KSIZE = 4
PAD = 1
BN_EPS = 1e-5


def _round_up(x, m):
    return ((x + m - 1) // m) * m


def _vmem_capacity_bytes():
    try:
        return int(pltpu.get_tpu_info().vmem_capacity_bytes)
    except Exception:
        return 64 << 20          # assume the smallest generation (v7x, 64 MiB)


_VMEM_CAP = _vmem_capacity_bytes()
_SMALL_VMEM = _VMEM_CAP <= (64 << 20)                 # v7x-like
_VMEM_CEIL = (30 << 20) if _SMALL_VMEM else (48 << 20)
_BN_ROW_TILE_CAP = 1024 if _SMALL_VMEM else 2048


def _vmem_limit(block_bytes):
    """Scoped-VMEM request: double-buffered blocks + slack, generation-capped."""
    need = 2 * block_bytes + (4 << 20)
    return int(min(max(need, 16 << 20), max(_VMEM_CEIL, need)))


# ---------------------------------------------------------------------------
# Kernel 1: convolution as a tiled (patch-rows @ weights) matmul.
#   x_ref : (TM, K)   bf16   K = 16 * Cin_pad (lane-dense)
#   w_ref : (K, TN)   bf16   resident across the inner row-tile axis
#   y_ref : (TM, TN)  bf16   conv output (optionally fused ReLU)
#   stats : (2, TN)   f32    per-block partial [sum; sum of squares] (BN only)
# ---------------------------------------------------------------------------
def _conv_matmul_kernel(x_ref, w_ref, *out_refs, relu, bn):
    if bn:
        y_ref, stats_ref = out_refs
    else:
        (y_ref,) = out_refs
    acc = jnp.dot(x_ref[...], w_ref[...], preferred_element_type=jnp.float32)
    if relu:
        acc = jnp.maximum(acc, 0.0)
    y_ref[...] = acc.astype(y_ref.dtype)
    if bn:
        s1 = jnp.sum(acc, axis=0, keepdims=True)
        s2 = jnp.sum(acc * acc, axis=0, keepdims=True)
        stats_ref[...] = jnp.concatenate([s1, s2], axis=0)


def conv_matmul_pallas(x2d, w2d, *, tm, relu, bn):
    """x2d: (M_pad, K) bf16 patch rows, w2d: (K, Npad) bf16 reordered weights."""
    M_pad, K = x2d.shape
    K_w, Npad = w2d.shape
    assert K == K_w and M_pad % tm == 0 and Npad % 128 == 0
    TN = 128                     # safe on v5e's 128-wide MXU, spill-free acc
    n_mt = M_pad // tm
    n_ct = Npad // TN

    block_bytes = (tm * K + K * TN + tm * TN) * 2 + (2 * TN * 4 if bn else 0)
    kernel = functools.partial(_conv_matmul_kernel, relu=relu, bn=bn)

    y_shape = jax.ShapeDtypeStruct((M_pad, Npad), jnp.bfloat16)
    y_spec = pl.BlockSpec((tm, TN), lambda j, i: (i, j))
    in_specs = [
        pl.BlockSpec((tm, K), lambda j, i: (i, 0)),      # patch rows stream
        pl.BlockSpec((K, TN), lambda j, i: (0, j)),      # weights stay resident
    ]
    if bn:
        out_shape = (y_shape,
                     jax.ShapeDtypeStruct((n_mt, 2, Npad), jnp.float32))
        out_specs = [y_spec,
                     pl.BlockSpec((None, 2, TN), lambda j, i: (i, 0, j))]
    else:
        out_shape = y_shape
        out_specs = y_spec

    res = pl.pallas_call(
        kernel,
        out_shape=out_shape,
        grid_spec=pltpu.PrefetchScalarGridSpec(
            num_scalar_prefetch=0,
            grid=(n_ct, n_mt),          # cout tiles outer, row tiles inner
            in_specs=in_specs,
            out_specs=out_specs),
        compiler_params=pltpu.CompilerParams(
            dimension_semantics=("parallel", "parallel"),
            vmem_limit_bytes=_vmem_limit(block_bytes)),
    )(x2d, w2d)
    if bn:
        return res[0], res[1]
    return res, None


# ---------------------------------------------------------------------------
# Kernel 2: BatchNorm apply (+ ReLU), lane-dense tiled elementwise pass.
# ---------------------------------------------------------------------------
def _bn_act_kernel(y_ref, scale_ref, shift_ref, o_ref, *, relu):
    y = y_ref[...].astype(jnp.float32) * scale_ref[...] + shift_ref[...]
    if relu:
        y = jnp.maximum(y, 0.0)
    o_ref[...] = y.astype(o_ref.dtype)


def bn_relu_pallas(y2d, scale, shift, *, relu):
    M, N = y2d.shape
    TM = M
    for cand in (_BN_ROW_TILE_CAP, 1024, 512, 256, 128, 64, 32, 16, 8):
        if cand <= M and M % cand == 0:
            TM = cand
            break
    block_bytes = 2 * TM * N * 2 + 2 * N * 4
    return pl.pallas_call(
        functools.partial(_bn_act_kernel, relu=relu),
        out_shape=jax.ShapeDtypeStruct((M, N), y2d.dtype),
        grid_spec=pltpu.PrefetchScalarGridSpec(
            num_scalar_prefetch=0,
            grid=(M // TM,),
            in_specs=[pl.BlockSpec((TM, N), lambda i: (i, 0)),
                      pl.BlockSpec((1, N), lambda i: (0, 0)),
                      pl.BlockSpec((1, N), lambda i: (0, 0))],
            out_specs=pl.BlockSpec((TM, N), lambda i: (i, 0))),
        compiler_params=pltpu.CompilerParams(
            dimension_semantics=("parallel",),
            vmem_limit_bytes=_vmem_limit(block_bytes)),
    )(y2d, scale, shift)


# ---------------------------------------------------------------------------
# Plain-JAX glue: lane-dense patch rows (tap-major, channel-minor -> K dim).
# ---------------------------------------------------------------------------
def im2col_rows(x, cin_pad, stride):
    """x: (B,H,W,C) bf16 -> patch rows (B*HO*WO, 16*cin_pad) bf16, HO, WO."""
    B, H, W, C = x.shape
    if C < cin_pad:
        x = jnp.pad(x, ((0, 0), (0, 0), (0, 0), (0, cin_pad - C)))
    xp = jnp.pad(x, ((0, 0), (PAD, PAD), (PAD, PAD), (0, 0)))
    Hp, Wp = H + 2 * PAD, W + 2 * PAD
    HO = (Hp - KSIZE) // stride + 1
    WO = (Wp - KSIZE) // stride + 1
    taps = []
    for ki in range(KSIZE):
        for kj in range(KSIZE):
            taps.append(xp[:, ki:ki + (HO - 1) * stride + 1:stride,
                              kj:kj + (WO - 1) * stride + 1:stride, :])
    col = jnp.concatenate(taps, axis=-1)            # (B, HO, WO, 16*cin_pad)
    return col.reshape(B * HO * WO, KSIZE * KSIZE * cin_pad), HO, WO


# ---------------------------------------------------------------------------
# Parameters (deterministic, synthetic — module __init__ only defines shapes)
# ---------------------------------------------------------------------------
def make_params(key, conv_dim):
    specs = [
        # (cin, cout, stride, batch_norm, relu)
        (3,            conv_dim,     2, False, True),
        (conv_dim,     conv_dim * 2, 2, True,  True),
        (conv_dim * 2, conv_dim * 4, 2, True,  True),
        (conv_dim * 4, conv_dim * 8, 2, True,  True),
        (conv_dim * 8, 1,            1, False, False),
    ]
    params = []
    for cin, cout, stride, bn, relu in specs:
        key, wk = jax.random.split(key)
        w_oihw = 0.05 * jax.random.normal(wk, (cout, cin, KSIZE, KSIZE),
                                          jnp.float32)
        cin_pad = _round_up(cin, 8)                 # K = 16*cin_pad % 128 == 0
        npad = _round_up(cout, 128)                 # lane-dense output stores
        # (O,I,Kh,Kw) -> (Kh,Kw,I,O), zero-pad I and O, flatten K tap-major.
        w = jnp.transpose(w_oihw, (2, 3, 1, 0))
        w = jnp.pad(w, ((0, 0), (0, 0), (0, cin_pad - cin), (0, npad - cout)))
        w2d = w.reshape(KSIZE * KSIZE * cin_pad, npad).astype(jnp.bfloat16)
        params.append(dict(
            w_oihw=w_oihw, w2d=w2d,
            gamma=jnp.ones((cout,), jnp.float32),   # BatchNorm2d default init
            beta=jnp.zeros((cout,), jnp.float32),
            cin=cin, cin_pad=cin_pad, cout=cout, npad=npad,
            stride=stride, bn=bn, relu=relu))
    return params


# ---------------------------------------------------------------------------
# Forward passes
# ---------------------------------------------------------------------------
def conv_block(x, p):
    B = x.shape[0]
    x2d, HO, WO = im2col_rows(x, p["cin_pad"], p["stride"])
    M = B * HO * WO
    tm = 256 if M >= 256 else _round_up(M, 8)
    M_pad = _round_up(M, tm)
    if M_pad != M:
        # Zero rows are inert: they add 0 to the matmul and 0 to the BN sums.
        x2d = jnp.pad(x2d, ((0, M_pad - M), (0, 0)))

    y, stats = conv_matmul_pallas(x2d, p["w2d"], tm=tm,
                                  relu=(p["relu"] and not p["bn"]),
                                  bn=p["bn"])
    if p["bn"]:
        # Training-mode BatchNorm2d: biased statistics over (B, Ho, Wo).
        s = jnp.sum(stats, axis=0)                  # (2, Npad)
        cnt = float(M)
        mean = s[0] / cnt
        var = jnp.maximum(s[1] / cnt - mean * mean, 0.0)
        inv_std = jax.lax.rsqrt(var + BN_EPS)
        gamma = jnp.pad(p["gamma"], (0, p["npad"] - p["cout"]))
        beta = jnp.pad(p["beta"], (0, p["npad"] - p["cout"]))
        scale = (gamma * inv_std).astype(jnp.float32)
        shift = (beta - mean * gamma * inv_std).astype(jnp.float32)
        y = bn_relu_pallas(y, scale.reshape(1, -1), shift.reshape(1, -1),
                           relu=p["relu"])
    return y[:M, :p["cout"]].reshape(B, HO, WO, p["cout"])


def discriminator_forward(x_nchw, params):
    x = jnp.transpose(x_nchw, (0, 2, 3, 1)).astype(jnp.bfloat16)   # NCHW->NHWC
    for p in params:
        x = conv_block(x, p)
    return jnp.transpose(x, (0, 3, 1, 2)).astype(jnp.float32)      # NHWC->NCHW


def reference_forward(x_nchw, params):
    """Pure-JAX f32 reference (lax.conv) for validation."""
    x = jnp.transpose(x_nchw, (0, 2, 3, 1))
    for p in params:
        w = jnp.transpose(p["w_oihw"], (2, 3, 1, 0))   # HWIO
        y = jax.lax.conv_general_dilated(
            x, w, (p["stride"], p["stride"]), ((PAD, PAD), (PAD, PAD)),
            dimension_numbers=("NHWC", "HWIO", "NHWC"))
        if p["bn"]:
            mean = jnp.mean(y, axis=(0, 1, 2), keepdims=True)
            var = jnp.mean((y - mean) ** 2, axis=(0, 1, 2), keepdims=True)
            y = (y - mean) * jax.lax.rsqrt(var + BN_EPS) * p["gamma"] + p["beta"]
        if p["relu"]:
            y = jnp.maximum(y, 0.0)
        x = y
    return jnp.transpose(x, (0, 3, 1, 2))


if __name__ == "__main__":
    key = jax.random.PRNGKey(0)
    pkey, xkey = jax.random.split(key)

    conv_dim = 8                       # small stand-in for the default 64
    params = make_params(pkey, conv_dim)

    # Spatial 32 is the smallest size keeping every conv output non-empty:
    # 32 -> 16 -> 8 -> 4 -> 2 -> 1.  (Production validation should rerun at
    # conv_dim=64, 256x256, B>=8 per generation — review item 12.)
    x = jax.random.normal(xkey, (2, 3, 32, 32), jnp.float32)

    fwd = jax.jit(lambda inp: discriminator_forward(inp, params))
    out = jax.block_until_ready(fwd(x))
    ref = jax.block_until_ready(reference_forward(x, params))

    assert out.shape == (2, 1, 1, 1), out.shape
    # bf16 matmuls with f32 accumulation: loose tolerance vs the f32 reference.
    err = float(jnp.max(jnp.abs(out - ref)))
    assert jnp.allclose(out, ref, rtol=1e-1, atol=1e-1), err
    print("KERNEL_OK")
</pallas_src>

<mosaic_0001>
module attributes {stable_mosaic.version = 11 : i64} {
  func.func @_conv_matmul_kernel(%arg0: i32, %arg1: i32, %arg2: memref<256x128xbf16, #tpu.memory_space<vmem>>, %arg3: memref<128x128xbf16, #tpu.memory_space<vmem>>, %arg4: memref<256x128xbf16, #tpu.memory_space<vmem>>) attributes {dimension_semantics = [#tpu.dimension_semantics<parallel>, #tpu.dimension_semantics<parallel>], iteration_bounds = array<i64: 1, 2>, scalar_prefetch = 0 : i64, scratch_operands = 0 : i64, tpu.core_type = #tpu.core_type<tc>, window_params = [{transform_indices = @transform_0, window_bounds = array<i64: 256, 128>}, {transform_indices = @transform_1, window_bounds = array<i64: 128, 128>}, {transform_indices = @transform_2, window_bounds = array<i64: 256, 128>}]} {
    %c0 = arith.constant 0 : index
    %c0_0 = arith.constant 0 : index
    %0 = vector.load %arg2[%c0, %c0_0] : memref<256x128xbf16, #tpu.memory_space<vmem>>, vector<256x128xbf16>
    %c0_1 = arith.constant 0 : index
    %c0_2 = arith.constant 0 : index
    %1 = vector.load %arg3[%c0_1, %c0_2] : memref<128x128xbf16, #tpu.memory_space<vmem>>, vector<128x128xbf16>
    %cst = arith.constant dense<0.000000e+00> : vector<256x128xf32>
    %2 = tpu.matmul %0, %1, %cst {dimension_numbers = #tpu.dot_dimension_numbers<[1], [0], [0], [1], [0, 0, 1, 1], [], []>} : vector<256x128xbf16>, vector<128x128xbf16>, vector<256x128xf32> -> vector<256x128xf32>
    %cst_3 = arith.constant 0.000000e+00 : f32
    %3 = vector.broadcast %cst_3 : f32 to vector<256x128xf32>
    %4 = arith.maximumf %2, %3 : vector<256x128xf32>
    %5 = arith.truncf %4 : vector<256x128xf32> to vector<256x128xbf16>
    %c0_4 = arith.constant 0 : index
    %c0_5 = arith.constant 0 : index
    %6 = vector.load %arg4[%c0_4, %c0_5] : memref<256x128xbf16, #tpu.memory_space<vmem>>, vector<256x128xbf16>
    tpu.vector_store %arg4[%c0_4, %c0_5], %5 {strides = array<i32>} : memref<256x128xbf16, #tpu.memory_space<vmem>>, vector<256x128xbf16>,
    return
  }
  func.func @transform_0(%arg0: i32, %arg1: i32) -> (i32, i32) {
    %c0_i32 = arith.constant 0 : i32
    %c0_i32_0 = arith.constant 0 : i32
    return %arg1, %c0_i32 : i32, i32
  }
  func.func @transform_1(%arg0: i32, %arg1: i32) -> (i32, i32) {
    %c0_i32 = arith.constant 0 : i32
    %c0_i32_0 = arith.constant 0 : i32
    return %c0_i32, %arg0 : i32, i32
  }
  func.func @transform_2(%arg0: i32, %arg1: i32) -> (i32, i32) {
    %c0_i32 = arith.constant 0 : i32
    return %arg1, %arg0 : i32, i32
  }
}

module attributes {stable_mosaic.version = 11 : i64} {
  func.func @_conv_matmul_kernel(%arg0: i32, %arg1: i32, %arg2: memref<128x128xbf16, #tpu.memory_space<vmem>>, %arg3: memref<128x128xbf16, #tpu.memory_space<vmem>>, %arg4: memref<128x128xbf16, #tpu.memory_space<vmem>>, %arg5: memref<1x2x128xf32, #tpu.memory_space<vmem>>) attributes {dimension_semantics = [#tpu.dimension_semantics<parallel>, #tpu.dimension_semantics<parallel>], iteration_bounds = array<i64: 1, 1>, scalar_prefetch = 0 : i64, scratch_operands = 0 : i64, tpu.core_type = #tpu.core_type<tc>, window_params = [{transform_indices = @transform_0, window_bounds = array<i64: 128, 128>}, {transform_indices = @transform_1, window_bounds = array<i64: 128, 128>}, {transform_indices = @transform_2, window_bounds = array<i64: 128, 128>}, {transform_indices = @transform_3, window_bounds = array<i64: 1, 2, 128>}]} {
    %c0 = arith.constant 0 : index
    %c0_0 = arith.constant 0 : index
    %0 = vector.load %arg2[%c0, %c0_0] : memref<128x128xbf16, #tpu.memory_space<vmem>>, vector<128x128xbf16>
    %c0_1 = arith.constant 0 : index
    %c0_2 = arith.constant 0 : index
    %1 = vector.load %arg3[%c0_1, %c0_2] : memref<128x128xbf16, #tpu.memory_space<vmem>>, vector<128x128xbf16>
    %cst = arith.constant dense<0.000000e+00> : vector<128x128xf32>
    %2 = tpu.matmul %0, %1, %cst {dimension_numbers = #tpu.dot_dimension_numbers<[1], [0], [0], [1], [0, 0, 1, 1], [], []>} : vector<128x128xbf16>, vector<128x128xbf16>, vector<128x128xf32> -> vector<128x128xf32>
    %3 = arith.truncf %2 : vector<128x128xf32> to vector<128x128xbf16>
    %c0_3 = arith.constant 0 : index
    %c0_4 = arith.constant 0 : index
    %4 = vector.load %arg4[%c0_3, %c0_4] : memref<128x128xbf16, #tpu.memory_space<vmem>>, vector<128x128xbf16>
    tpu.vector_store %arg4[%c0_3, %c0_4], %3 {strides = array<i32>} : memref<128x128xbf16, #tpu.memory_space<vmem>>, vector<128x128xbf16>,
    %cst_5 = arith.constant dense<0.000000e+00> : vector<128xf32>
    %5 = vector.multi_reduction <add>, %2, %cst_5 [0] : vector<128x128xf32> to vector<128xf32>
    %6 = vector.shape_cast %5 : vector<128xf32> to vector<1x128xf32>
    %7 = arith.mulf %2, %2 : vector<128x128xf32>
    %cst_6 = arith.constant dense<0.000000e+00> : vector<128xf32>
    %8 = vector.multi_reduction <add>, %7, %cst_6 [0] : vector<128x128xf32> to vector<128xf32>
    %9 = vector.shape_cast %8 : vector<128xf32> to vector<1x128xf32>
    %10 = tpu.concatenate %6, %9 in 0 : vector<1x128xf32>, vector<1x128xf32> -> vector<2x128xf32>
    %c0_7 = arith.constant 0 : index
    %c0_8 = arith.constant 0 : index
    %c0_9 = arith.constant 0 : index
    %11 = vector.load %arg5[%c0_7, %c0_8, %c0_9] : memref<1x2x128xf32, #tpu.memory_space<vmem>>, vector<1x2x128xf32>
    %12 = vector.shape_cast %11 : vector<1x2x128xf32> to vector<2x128xf32>
    %13 = vector.shape_cast %10 : vector<2x128xf32> to vector<1x2x128xf32>
    tpu.vector_store %arg5[%c0_7, %c0_8, %c0_9], %13 {strides = array<i32>} : memref<1x2x128xf32, #tpu.memory_space<vmem>>, vector<1x2x128xf32>,
    return
  }
  func.func @transform_0(%arg0: i32, %arg1: i32) -> (i32, i32) {
    %c0_i32 = arith.constant 0 : i32
    %c0_i32_0 = arith.constant 0 : i32
    return %arg1, %c0_i32 : i32, i32
  }
  func.func @transform_1(%arg0: i32, %arg1: i32) -> (i32, i32) {
    %c0_i32 = arith.constant 0 : i32
    %c0_i32_0 = arith.constant 0 : i32
    return %c0_i32, %arg0 : i32, i32
  }
  func.func @transform_2(%arg0: i32, %arg1: i32) -> (i32, i32) {
    %c0_i32 = arith.constant 0 : i32
    return %arg1, %arg0 : i32, i32
  }
  func.func @transform_3(%arg0: i32, %arg1: i32) -> (i32, i32, i32) {
    %c0_i32 = arith.constant 0 : i32
    %c0_i32_0 = arith.constant 0 : i32
    return %arg1, %c0_i32, %arg0 : i32, i32, i32
  }
}

module attributes {stable_mosaic.version = 11 : i64} {
  func.func @_bn_act_kernel(%arg0: i32, %arg1: memref<128x128xbf16, #tpu.memory_space<vmem>>, %arg2: memref<1x128xf32, #tpu.memory_space<vmem>>, %arg3: memref<1x128xf32, #tpu.memory_space<vmem>>, %arg4: memref<128x128xbf16, #tpu.memory_space<vmem>>) attributes {dimension_semantics = [#tpu.dimension_semantics<parallel>], iteration_bounds = array<i64: 1>, scalar_prefetch = 0 : i64, scratch_operands = 0 : i64, tpu.core_type = #tpu.core_type<tc>, window_params = [{transform_indices = @transform_0, window_bounds = array<i64: 128, 128>}, {pipeline_mode = #tpu.pipeline_mode<synchronous>, transform_indices = @transform_1, window_bounds = array<i64: 1, 128>}, {pipeline_mode = #tpu.pipeline_mode<synchronous>, transform_indices = @transform_2, window_bounds = array<i64: 1, 128>}, {transform_indices = @transform_3, window_bounds = array<i64: 128, 128>}]} {
    %c0 = arith.constant 0 : index
    %c0_0 = arith.constant 0 : index
    %0 = vector.load %arg1[%c0, %c0_0] : memref<128x128xbf16, #tpu.memory_space<vmem>>, vector<128x128xbf16>
    %1 = arith.extf %0 : vector<128x128xbf16> to vector<128x128xf32>
    %c0_1 = arith.constant 0 : index
    %c0_2 = arith.constant 0 : index
    %2 = vector.load %arg2[%c0_1, %c0_2] : memref<1x128xf32, #tpu.memory_space<vmem>>, vector<1x128xf32>
    %3 = vector.broadcast %2 : vector<1x128xf32> to vector<128x128xf32>
    %4 = arith.mulf %1, %3 : vector<128x128xf32>
    %c0_3 = arith.constant 0 : index
    %c0_4 = arith.constant 0 : index
    %5 = vector.load %arg3[%c0_3, %c0_4] : memref<1x128xf32, #tpu.memory_space<vmem>>, vector<1x128xf32>
    %6 = vector.broadcast %5 : vector<1x128xf32> to vector<128x128xf32>
    %7 = arith.addf %4, %6 : vector<128x128xf32>
    %cst = arith.constant 0.000000e+00 : f32
    %8 = vector.broadcast %cst : f32 to vector<128x128xf32>
    %9 = arith.maximumf %7, %8 : vector<128x128xf32>
    %10 = arith.truncf %9 : vector<128x128xf32> to vector<128x128xbf16>
    %c0_5 = arith.constant 0 : index
    %c0_6 = arith.constant 0 : index
    %11 = vector.load %arg4[%c0_5, %c0_6] : memref<128x128xbf16, #tpu.memory_space<vmem>>, vector<128x128xbf16>
    tpu.vector_store %arg4[%c0_5, %c0_6], %10 {strides = array<i32>} : memref<128x128xbf16, #tpu.memory_space<vmem>>, vector<128x128xbf16>,
    return
  }
  func.func @transform_0(%arg0: i32) -> (i32, i32) {
    %c0_i32 = arith.constant 0 : i32
    %c0_i32_0 = arith.constant 0 : i32
    return %arg0, %c0_i32 : i32, i32
  }
  func.func @transform_1(%arg0: i32) -> (i32, i32) {
    %c0_i32 = arith.constant 0 : i32
    %c0_i32_0 = arith.constant 0 : i32
    %c0_i32_1 = arith.constant 0 : i32
    return %c0_i32, %c0_i32_0 : i32, i32
  }
  func.func @transform_2(%arg0: i32) -> (i32, i32) {
    %c0_i32 = arith.constant 0 : i32
    %c0_i32_0 = arith.constant 0 : i32
    %c0_i32_1 = arith.constant 0 : i32
    return %c0_i32, %c0_i32_0 : i32, i32
  }
  func.func @transform_3(%arg0: i32) -> (i32, i32) {
    %c0_i32 = arith.constant 0 : i32
    %c0_i32_0 = arith.constant 0 : i32
    return %arg0, %c0_i32 : i32, i32
  }
}

module attributes {stable_mosaic.version = 11 : i64} {
  func.func @_conv_matmul_kernel(%arg0: i32, %arg1: i32, %arg2: memref<32x256xbf16, #tpu.memory_space<vmem>>, %arg3: memref<256x128xbf16, #tpu.memory_space<vmem>>, %arg4: memref<32x128xbf16, #tpu.memory_space<vmem>>, %arg5: memref<1x2x128xf32, #tpu.memory_space<vmem>>) attributes {dimension_semantics = [#tpu.dimension_semantics<parallel>, #tpu.dimension_semantics<parallel>], iteration_bounds = array<i64: 1, 1>, scalar_prefetch = 0 : i64, scratch_operands = 0 : i64, tpu.core_type = #tpu.core_type<tc>, window_params = [{transform_indices = @transform_0, window_bounds = array<i64: 32, 256>}, {transform_indices = @transform_1, window_bounds = array<i64: 256, 128>}, {transform_indices = @transform_2, window_bounds = array<i64: 32, 128>}, {transform_indices = @transform_3, window_bounds = array<i64: 1, 2, 128>}]} {
    %c0 = arith.constant 0 : index
    %c0_0 = arith.constant 0 : index
    %0 = vector.load %arg2[%c0, %c0_0] : memref<32x256xbf16, #tpu.memory_space<vmem>>, vector<32x256xbf16>
    %c0_1 = arith.constant 0 : index
    %c0_2 = arith.constant 0 : index
    %1 = vector.load %arg3[%c0_1, %c0_2] : memref<256x128xbf16, #tpu.memory_space<vmem>>, vector<256x128xbf16>
    %cst = arith.constant dense<0.000000e+00> : vector<32x128xf32>
    %2 = tpu.matmul %0, %1, %cst {dimension_numbers = #tpu.dot_dimension_numbers<[1], [0], [0], [1], [0, 0, 1, 1], [], []>} : vector<32x256xbf16>, vector<256x128xbf16>, vector<32x128xf32> -> vector<32x128xf32>
    %3 = arith.truncf %2 : vector<32x128xf32> to vector<32x128xbf16>
    %c0_3 = arith.constant 0 : index
    %c0_4 = arith.constant 0 : index
    %4 = vector.load %arg4[%c0_3, %c0_4] : memref<32x128xbf16, #tpu.memory_space<vmem>>, vector<32x128xbf16>
    tpu.vector_store %arg4[%c0_3, %c0_4], %3 {strides = array<i32>} : memref<32x128xbf16, #tpu.memory_space<vmem>>, vector<32x128xbf16>,
    %cst_5 = arith.constant dense<0.000000e+00> : vector<128xf32>
    %5 = vector.multi_reduction <add>, %2, %cst_5 [0] : vector<32x128xf32> to vector<128xf32>
    %6 = vector.shape_cast %5 : vector<128xf32> to vector<1x128xf32>
    %7 = arith.mulf %2, %2 : vector<32x128xf32>
    %cst_6 = arith.constant dense<0.000000e+00> : vector<128xf32>
    %8 = vector.multi_reduction <add>, %7, %cst_6 [0] : vector<32x128xf32> to vector<128xf32>
    %9 = vector.shape_cast %8 : vector<128xf32> to vector<1x128xf32>
    %10 = tpu.concatenate %6, %9 in 0 : vector<1x128xf32>, vector<1x128xf32> -> vector<2x128xf32>
    %c0_7 = arith.constant 0 : index
    %c0_8 = arith.constant 0 : index
    %c0_9 = arith.constant 0 : index
    %11 = vector.load %arg5[%c0_7, %c0_8, %c0_9] : memref<1x2x128xf32, #tpu.memory_space<vmem>>, vector<1x2x128xf32>
    %12 = vector.shape_cast %11 : vector<1x2x128xf32> to vector<2x128xf32>
    %13 = vector.shape_cast %10 : vector<2x128xf32> to vector<1x2x128xf32>
    tpu.vector_store %arg5[%c0_7, %c0_8, %c0_9], %13 {strides = array<i32>} : memref<1x2x128xf32, #tpu.memory_space<vmem>>, vector<1x2x128xf32>,
    return
  }
  func.func @transform_0(%arg0: i32, %arg1: i32) -> (i32, i32) {
    %c0_i32 = arith.constant 0 : i32
    %c0_i32_0 = arith.constant 0 : i32
    return %arg1, %c0_i32 : i32, i32
  }
  func.func @transform_1(%arg0: i32, %arg1: i32) -> (i32, i32) {
    %c0_i32 = arith.constant 0 : i32
    %c0_i32_0 = arith.constant 0 : i32
    return %c0_i32, %arg0 : i32, i32
  }
  func.func @transform_2(%arg0: i32, %arg1: i32) -> (i32, i32) {
    %c0_i32 = arith.constant 0 : i32
    return %arg1, %arg0 : i32, i32
  }
  func.func @transform_3(%arg0: i32, %arg1: i32) -> (i32, i32, i32) {
    %c0_i32 = arith.constant 0 : i32
    %c0_i32_0 = arith.constant 0 : i32
    return %arg1, %c0_i32, %arg0 : i32, i32, i32
  }
}

module attributes {stable_mosaic.version = 11 : i64} {
  func.func @_bn_act_kernel(%arg0: i32, %arg1: memref<32x128xbf16, #tpu.memory_space<vmem>>, %arg2: memref<1x128xf32, #tpu.memory_space<vmem>>, %arg3: memref<1x128xf32, #tpu.memory_space<vmem>>, %arg4: memref<32x128xbf16, #tpu.memory_space<vmem>>) attributes {dimension_semantics = [#tpu.dimension_semantics<parallel>], iteration_bounds = array<i64: 1>, scalar_prefetch = 0 : i64, scratch_operands = 0 : i64, tpu.core_type = #tpu.core_type<tc>, window_params = [{transform_indices = @transform_0, window_bounds = array<i64: 32, 128>}, {pipeline_mode = #tpu.pipeline_mode<synchronous>, transform_indices = @transform_1, window_bounds = array<i64: 1, 128>}, {pipeline_mode = #tpu.pipeline_mode<synchronous>, transform_indices = @transform_2, window_bounds = array<i64: 1, 128>}, {transform_indices = @transform_3, window_bounds = array<i64: 32, 128>}]} {
    %c0 = arith.constant 0 : index
    %c0_0 = arith.constant 0 : index
    %0 = vector.load %arg1[%c0, %c0_0] : memref<32x128xbf16, #tpu.memory_space<vmem>>, vector<32x128xbf16>
    %1 = arith.extf %0 : vector<32x128xbf16> to vector<32x128xf32>
    %c0_1 = arith.constant 0 : index
    %c0_2 = arith.constant 0 : index
    %2 = vector.load %arg2[%c0_1, %c0_2] : memref<1x128xf32, #tpu.memory_space<vmem>>, vector<1x128xf32>
    %3 = vector.broadcast %2 : vector<1x128xf32> to vector<32x128xf32>
    %4 = arith.mulf %1, %3 : vector<32x128xf32>
    %c0_3 = arith.constant 0 : index
    %c0_4 = arith.constant 0 : index
    %5 = vector.load %arg3[%c0_3, %c0_4] : memref<1x128xf32, #tpu.memory_space<vmem>>, vector<1x128xf32>
    %6 = vector.broadcast %5 : vector<1x128xf32> to vector<32x128xf32>
    %7 = arith.addf %4, %6 : vector<32x128xf32>
    %cst = arith.constant 0.000000e+00 : f32
    %8 = vector.broadcast %cst : f32 to vector<32x128xf32>
    %9 = arith.maximumf %7, %8 : vector<32x128xf32>
    %10 = arith.truncf %9 : vector<32x128xf32> to vector<32x128xbf16>
    %c0_5 = arith.constant 0 : index
    %c0_6 = arith.constant 0 : index
    %11 = vector.load %arg4[%c0_5, %c0_6] : memref<32x128xbf16, #tpu.memory_space<vmem>>, vector<32x128xbf16>
    tpu.vector_store %arg4[%c0_5, %c0_6], %10 {strides = array<i32>} : memref<32x128xbf16, #tpu.memory_space<vmem>>, vector<32x128xbf16>,
    return
  }
  func.func @transform_0(%arg0: i32) -> (i32, i32) {
    %c0_i32 = arith.constant 0 : i32
    %c0_i32_0 = arith.constant 0 : i32
    return %arg0, %c0_i32 : i32, i32
  }
  func.func @transform_1(%arg0: i32) -> (i32, i32) {
    %c0_i32 = arith.constant 0 : i32
    %c0_i32_0 = arith.constant 0 : i32
    %c0_i32_1 = arith.constant 0 : i32
    return %c0_i32, %c0_i32_0 : i32, i32
  }
  func.func @transform_2(%arg0: i32) -> (i32, i32) {
    %c0_i32 = arith.constant 0 : i32
    %c0_i32_0 = arith.constant 0 : i32
    %c0_i32_1 = arith.constant 0 : i32
    return %c0_i32, %c0_i32_0 : i32, i32
  }
  func.func @transform_3(%arg0: i32) -> (i32, i32) {
    %c0_i32 = arith.constant 0 : i32
    %c0_i32_0 = arith.constant 0 : i32
    return %arg0, %c0_i32 : i32, i32
  }
}

module attributes {stable_mosaic.version = 11 : i64} {
  func.func @_conv_matmul_kernel(%arg0: i32, %arg1: i32, %arg2: memref<8x512xbf16, #tpu.memory_space<vmem>>, %arg3: memref<512x128xbf16, #tpu.memory_space<vmem>>, %arg4: memref<8x128xbf16, #tpu.memory_space<vmem>>, %arg5: memref<1x2x128xf32, #tpu.memory_space<vmem>>) attributes {dimension_semantics = [#tpu.dimension_semantics<parallel>, #tpu.dimension_semantics<parallel>], iteration_bounds = array<i64: 1, 1>, scalar_prefetch = 0 : i64, scratch_operands = 0 : i64, tpu.core_type = #tpu.core_type<tc>, window_params = [{transform_indices = @transform_0, window_bounds = array<i64: 8, 512>}, {transform_indices = @transform_1, window_bounds = array<i64: 512, 128>}, {transform_indices = @transform_2, window_bounds = array<i64: 8, 128>}, {transform_indices = @transform_3, window_bounds = array<i64: 1, 2, 128>}]} {
    %c0 = arith.constant 0 : index
    %c0_0 = arith.constant 0 : index
    %0 = vector.load %arg2[%c0, %c0_0] : memref<8x512xbf16, #tpu.memory_space<vmem>>, vector<8x512xbf16>
    %c0_1 = arith.constant 0 : index
    %c0_2 = arith.constant 0 : index
    %1 = vector.load %arg3[%c0_1, %c0_2] : memref<512x128xbf16, #tpu.memory_space<vmem>>, vector<512x128xbf16>
    %cst = arith.constant dense<0.000000e+00> : vector<8x128xf32>
    %2 = tpu.matmul %0, %1, %cst {dimension_numbers = #tpu.dot_dimension_numbers<[1], [0], [0], [1], [0, 0, 1, 1], [], []>} : vector<8x512xbf16>, vector<512x128xbf16>, vector<8x128xf32> -> vector<8x128xf32>
    %3 = arith.truncf %2 : vector<8x128xf32> to vector<8x128xbf16>
    %c0_3 = arith.constant 0 : index
    %c0_4 = arith.constant 0 : index
    %4 = vector.load %arg4[%c0_3, %c0_4] : memref<8x128xbf16, #tpu.memory_space<vmem>>, vector<8x128xbf16>
    tpu.vector_store %arg4[%c0_3, %c0_4], %3 {strides = array<i32>} : memref<8x128xbf16, #tpu.memory_space<vmem>>, vector<8x128xbf16>,
    %cst_5 = arith.constant dense<0.000000e+00> : vector<128xf32>
    %5 = vector.multi_reduction <add>, %2, %cst_5 [0] : vector<8x128xf32> to vector<128xf32>
    %6 = vector.shape_cast %5 : vector<128xf32> to vector<1x128xf32>
    %7 = arith.mulf %2, %2 : vector<8x128xf32>
    %cst_6 = arith.constant dense<0.000000e+00> : vector<128xf32>
    %8 = vector.multi_reduction <add>, %7, %cst_6 [0] : vector<8x128xf32> to vector<128xf32>
    %9 = vector.shape_cast %8 : vector<128xf32> to vector<1x128xf32>
    %10 = tpu.concatenate %6, %9 in 0 : vector<1x128xf32>, vector<1x128xf32> -> vector<2x128xf32>
    %c0_7 = arith.constant 0 : index
    %c0_8 = arith.constant 0 : index
    %c0_9 = arith.constant 0 : index
    %11 = vector.load %arg5[%c0_7, %c0_8, %c0_9] : memref<1x2x128xf32, #tpu.memory_space<vmem>>, vector<1x2x128xf32>
    %12 = vector.shape_cast %11 : vector<1x2x128xf32> to vector<2x128xf32>
    %13 = vector.shape_cast %10 : vector<2x128xf32> to vector<1x2x128xf32>
    tpu.vector_store %arg5[%c0_7, %c0_8, %c0_9], %13 {strides = array<i32>} : memref<1x2x128xf32, #tpu.memory_space<vmem>>, vector<1x2x128xf32>,
    return
  }
  func.func @transform_0(%arg0: i32, %arg1: i32) -> (i32, i32) {
    %c0_i32 = arith.constant 0 : i32
    %c0_i32_0 = arith.constant 0 : i32
    return %arg1, %c0_i32 : i32, i32
  }
  func.func @transform_1(%arg0: i32, %arg1: i32) -> (i32, i32) {
    %c0_i32 = arith.constant 0 : i32
    %c0_i32_0 = arith.constant 0 : i32
    return %c0_i32, %arg0 : i32, i32
  }
  func.func @transform_2(%arg0: i32, %arg1: i32) -> (i32, i32) {
    %c0_i32 = arith.constant 0 : i32
    return %arg1, %arg0 : i32, i32
  }
  func.func @transform_3(%arg0: i32, %arg1: i32) -> (i32, i32, i32) {
    %c0_i32 = arith.constant 0 : i32
    %c0_i32_0 = arith.constant 0 : i32
    return %arg1, %c0_i32, %arg0 : i32, i32, i32
  }
}

module attributes {stable_mosaic.version = 11 : i64} {
  func.func @_bn_act_kernel(%arg0: i32, %arg1: memref<8x128xbf16, #tpu.memory_space<vmem>>, %arg2: memref<1x128xf32, #tpu.memory_space<vmem>>, %arg3: memref<1x128xf32, #tpu.memory_space<vmem>>, %arg4: memref<8x128xbf16, #tpu.memory_space<vmem>>) attributes {dimension_semantics = [#tpu.dimension_semantics<parallel>], iteration_bounds = array<i64: 1>, scalar_prefetch = 0 : i64, scratch_operands = 0 : i64, tpu.core_type = #tpu.core_type<tc>, window_params = [{transform_indices = @transform_0, window_bounds = array<i64: 8, 128>}, {pipeline_mode = #tpu.pipeline_mode<synchronous>, transform_indices = @transform_1, window_bounds = array<i64: 1, 128>}, {pipeline_mode = #tpu.pipeline_mode<synchronous>, transform_indices = @transform_2, window_bounds = array<i64: 1, 128>}, {transform_indices = @transform_3, window_bounds = array<i64: 8, 128>}]} {
    %c0 = arith.constant 0 : index
    %c0_0 = arith.constant 0 : index
    %0 = vector.load %arg1[%c0, %c0_0] : memref<8x128xbf16, #tpu.memory_space<vmem>>, vector<8x128xbf16>
    %1 = arith.extf %0 : vector<8x128xbf16> to vector<8x128xf32>
    %c0_1 = arith.constant 0 : index
    %c0_2 = arith.constant 0 : index
    %2 = vector.load %arg2[%c0_1, %c0_2] : memref<1x128xf32, #tpu.memory_space<vmem>>, vector<1x128xf32>
    %3 = vector.broadcast %2 : vector<1x128xf32> to vector<8x128xf32>
    %4 = arith.mulf %1, %3 : vector<8x128xf32>
    %c0_3 = arith.constant 0 : index
    %c0_4 = arith.constant 0 : index
    %5 = vector.load %arg3[%c0_3, %c0_4] : memref<1x128xf32, #tpu.memory_space<vmem>>, vector<1x128xf32>
    %6 = vector.broadcast %5 : vector<1x128xf32> to vector<8x128xf32>
    %7 = arith.addf %4, %6 : vector<8x128xf32>
    %cst = arith.constant 0.000000e+00 : f32
    %8 = vector.broadcast %cst : f32 to vector<8x128xf32>
    %9 = arith.maximumf %7, %8 : vector<8x128xf32>
    %10 = arith.truncf %9 : vector<8x128xf32> to vector<8x128xbf16>
    %c0_5 = arith.constant 0 : index
    %c0_6 = arith.constant 0 : index
    %11 = vector.load %arg4[%c0_5, %c0_6] : memref<8x128xbf16, #tpu.memory_space<vmem>>, vector<8x128xbf16>
    tpu.vector_store %arg4[%c0_5, %c0_6], %10 {strides = array<i32>} : memref<8x128xbf16, #tpu.memory_space<vmem>>, vector<8x128xbf16>,
    return
  }
  func.func @transform_0(%arg0: i32) -> (i32, i32) {
    %c0_i32 = arith.constant 0 : i32
    %c0_i32_0 = arith.constant 0 : i32
    return %arg0, %c0_i32 : i32, i32
  }
  func.func @transform_1(%arg0: i32) -> (i32, i32) {
    %c0_i32 = arith.constant 0 : i32
    %c0_i32_0 = arith.constant 0 : i32
    %c0_i32_1 = arith.constant 0 : i32
    return %c0_i32, %c0_i32_0 : i32, i32
  }
  func.func @transform_2(%arg0: i32) -> (i32, i32) {
    %c0_i32 = arith.constant 0 : i32
    %c0_i32_0 = arith.constant 0 : i32
    %c0_i32_1 = arith.constant 0 : i32
    return %c0_i32, %c0_i32_0 : i32, i32
  }
  func.func @transform_3(%arg0: i32) -> (i32, i32) {
    %c0_i32 = arith.constant 0 : i32
    %c0_i32_0 = arith.constant 0 : i32
    return %arg0, %c0_i32 : i32, i32
  }
}

module attributes {stable_mosaic.version = 11 : i64} {
  func.func @_conv_matmul_kernel(%arg0: i32, %arg1: i32, %arg2: memref<8x1024xbf16, #tpu.memory_space<vmem>>, %arg3: memref<1024x128xbf16, #tpu.memory_space<vmem>>, %arg4: memref<8x128xbf16, #tpu.memory_space<vmem>>) attributes {dimension_semantics = [#tpu.dimension_semantics<parallel>, #tpu.dimension_semantics<parallel>], iteration_bounds = array<i64: 1, 1>, scalar_prefetch = 0 : i64, scratch_operands = 0 : i64, tpu.core_type = #tpu.core_type<tc>, window_params = [{transform_indices = @transform_0, window_bounds = array<i64: 8, 1024>}, {transform_indices = @transform_1, window_bounds = array<i64: 1024, 128>}, {transform_indices = @transform_2, window_bounds = array<i64: 8, 128>}]} {
    %c0 = arith.constant 0 : index
    %c0_0 = arith.constant 0 : index
    %0 = vector.load %arg2[%c0, %c0_0] : memref<8x1024xbf16, #tpu.memory_space<vmem>>, vector<8x1024xbf16>
    %c0_1 = arith.constant 0 : index
    %c0_2 = arith.constant 0 : index
    %1 = vector.load %arg3[%c0_1, %c0_2] : memref<1024x128xbf16, #tpu.memory_space<vmem>>, vector<1024x128xbf16>
    %cst = arith.constant dense<0.000000e+00> : vector<8x128xf32>
    %2 = tpu.matmul %0, %1, %cst {dimension_numbers = #tpu.dot_dimension_numbers<[1], [0], [0], [1], [0, 0, 1, 1], [], []>} : vector<8x1024xbf16>, vector<1024x128xbf16>, vector<8x128xf32> -> vector<8x128xf32>
    %3 = arith.truncf %2 : vector<8x128xf32> to vector<8x128xbf16>
    %c0_3 = arith.constant 0 : index
    %c0_4 = arith.constant 0 : index
    %4 = vector.load %arg4[%c0_3, %c0_4] : memref<8x128xbf16, #tpu.memory_space<vmem>>, vector<8x128xbf16>
    tpu.vector_store %arg4[%c0_3, %c0_4], %3 {strides = array<i32>} : memref<8x128xbf16, #tpu.memory_space<vmem>>, vector<8x128xbf16>,
    return
  }
  func.func @transform_0(%arg0: i32, %arg1: i32) -> (i32, i32) {
    %c0_i32 = arith.constant 0 : i32
    %c0_i32_0 = arith.constant 0 : i32
    return %arg1, %c0_i32 : i32, i32
  }
  func.func @transform_1(%arg0: i32, %arg1: i32) -> (i32, i32) {
    %c0_i32 = arith.constant 0 : i32
    %c0_i32_0 = arith.constant 0 : i32
    return %c0_i32, %arg0 : i32, i32
  }
  func.func @transform_2(%arg0: i32, %arg1: i32) -> (i32, i32) {
    %c0_i32 = arith.constant 0 : i32
    return %arg1, %arg0 : i32, i32
  }
}

</mosaic_0001>

<bundles_post_ra>
// kernel: _lambda_.8
= control target key start
LH: loop header
LB: loop body
LE: loop exit
PB: predicated region body
PF: predicated region fallthrough
CT: control target
= control target key end

     0   :  { %s1190_s9 = smov 0   ;;  %s1192_s10 = smov 0   ;;  %s1290_s0 = inlined_call_operand.vmem [shape: bf16[512,128], index: 0, kind: input, shape index: {}]   ;;  %s1291_s1 = inlined_call_operand.vmem [shape: bf16[128,128], index: 1, kind: input, shape index: {}]   ;;  %s1292_s2 = inlined_call_operand.vmem [shape: bf16[512,128], index: 2, kind: output, shape index: {}]  }
   0x1   :  { %s1194_s11 = smov 0  }
   0x2 LB: > { %s21_s12 = sadd.s32 1, %s1169_s10  ;;  %p825_p0 = scmp.ge.s32.totalorder %s1173_s11, 1  ;;  %s1173_s11 = sphi %s1194_s11, %s12_s11   ;;  %s1169_s10 = sphi %s1192_s10, %s1294_s10   ;;  %s1165_s9 = sphi %s1190_s9, %s1293_s9  }
   0x3   : > { %p22_p1 = scmp.ge.s32.totalorder %s21_s12, 2  ;;  %p136_p2 = scmp.lt.s32.totalorder %s1173_s11, 3 }
   0x5   : > { %s1296_s12 = smov (%p22_p1, %s21_s12), 0  ;;  %p137_p3 = pnand %p825_p0, %p136_p2 }
   0x6   : > { %s826_s15 = sshll.u32 (!%p137_p3), %s1165_s9, 5 }
   0x7   : > { %140 = sbr.rel (%p137_p3) target bundleno = 273 (0x111), region = 28  ;;  %p166_p4 = scmp.lt.s32.totalorder (!%p137_p3), %s826_s15, 63 }
   0xc   : > { %v1127_v0 = vld [vmem:[%s1291_s1 + $0x38] sm:$0xff]   ;;  %v1128_v1 = vld [vmem:[%s1291_s1 + $0x30] sm:$0xff]   ;;  %s1298_s15 = smov (!%p166_p4, %s826_s15), 63  ;;  %v1129_v2 = vld [vmem:[%s1291_s1 + $0x28] sm:$0xff]  }
   0xd   : > { %1039 = vmatprep.subr.bf16.mxu0 %v1127_v0  ;;  %1087 = vmatprep.subr.bf16.mxu1 %v1127_v0  ;;  %s827_s20 = sshll.u32 %s1298_s15, 2  ;;  %v1130_v3 = vld [vmem:[%s1291_s1 + $0x20] sm:$0xff]   ;;  %v1131_v6 = vld [vmem:[%s1291_s1 + $0x18] sm:$0xff]   ;;  %v1132_v7 = vld [vmem:[%s1291_s1 + $0x10] sm:$0xff]  }
   0xe   : > { %1040 = vmatpush3.bf16.msra.mxu0 %v1127_v0  ;;  %1095 = vmatpush3.bf16.msra.mxu1 %v1127_v0  ;;  %s1225_s23 = scalar_lea.vmem %s1290_s0, %s827_s20  ;;  %v1133_v8 = vld [vmem:[%s1291_s1 + $0x8] sm:$0xff]   ;;  %v1134_v9 = vld [vmem:[%s1291_s1] sm:$0xff]   ;;  %s1263_s8 = scalar_lea.vmem %s1292_s2, %s827_s20 }
   0xf   : > { %1041 = vmatprep.subr.bf16.mxu0 %v1128_v1  ;;  %1088 = vmatprep.subr.bf16.mxu1 %v1128_v1  ;;  %v1135_v4 = vld [vmem:[%s1225_s23] sm:$0xff]   ;;  %v1137_v10 = vld [vmem:[%s1225_s23 + $0x8] sm:$0xff]   ;;  %v1139_v12 = vld [vmem:[%s1225_s23 + $0x10] sm:$0xff]  }
  0x10   : > { %v1136_v5 = vld [vmem:[%s1225_s23 + $0x40] sm:$0xff]   ;;  %1055 = vmatprep.mubr.bf16.mxu0 %v1135_v4  ;;  %v1138_v11 = vld [vmem:[%s1225_s23 + $0x48] sm:$0xff]   ;;  %v1140_v13 = vld [vmem:[%s1225_s23 + $0x50] sm:$0xff]  }
  0x11   : > { %1071 = vmatprep.mubr.bf16.mxu1 %v1136_v5  ;;  %v1141_v14 = vld [vmem:[%s1225_s23 + $0x18] sm:$0xff]   ;;  %v1143_v16 = vld [vmem:[%s1225_s23 + $0x20] sm:$0xff]   ;;  %v1145_v18 = vld [vmem:[%s1225_s23 + $0x28] sm:$0xff]  }
  0x12   : > { %1042 = vmatpush3.bf16.msra.mxu0 %v1128_v1  ;;  %1096 = vmatpush3.bf16.msra.mxu1 %v1128_v1  ;;  %v1142_v15 = vld [vmem:[%s1225_s23 + $0x58] sm:$0xff]   ;;  %v1144_v17 = vld [vmem:[%s1225_s23 + $0x60] sm:$0xff]   ;;  %v1146_v19 = vld [vmem:[%s1225_s23 + $0x68] sm:$0xff]  }
  0x13   : > { %1043 = vmatprep.subr.bf16.mxu0 %v1129_v2  ;;  %1089 = vmatprep.subr.bf16.mxu1 %v1129_v2  ;;  %v1147_v20 = vld [vmem:[%s1225_s23 + $0x30] sm:$0xff]   ;;  %v1149_v22 = vld [vmem:[%s1225_s23 + $0x38] sm:$0xff]  }
  0x14   : > { %v1148_v21 = vld [vmem:[%s1225_s23 + $0x70] sm:$0xff]   ;;  %v1150_v23 = vld [vmem:[%s1225_s23 + $0x78] sm:$0xff]  }
  0x16   : > { %1044 = vmatpush3.bf16.msra.mxu0 %v1129_v2  ;;  %1097 = vmatpush3.bf16.msra.mxu1 %v1129_v2 }
  0x17   : > { %1045 = vmatprep.subr.bf16.mxu0 %v1130_v3  ;;  %1090 = vmatprep.subr.bf16.mxu1 %v1130_v3 }
  0x1a   : > { %1046 = vmatpush3.bf16.msra.mxu0 %v1130_v3  ;;  %1098 = vmatpush3.bf16.msra.mxu1 %v1130_v3 }
  0x1b   : > { %1047 = vmatprep.subr.bf16.mxu0 %v1131_v6  ;;  %1091 = vmatprep.subr.bf16.mxu1 %v1131_v6 }
  0x1e   : > { %1048 = vmatpush3.bf16.msra.mxu0 %v1131_v6  ;;  %1099 = vmatpush3.bf16.msra.mxu1 %v1131_v6 }
  0x1f   : > { %1049 = vmatprep.subr.bf16.mxu0 %v1132_v7  ;;  %1092 = vmatprep.subr.bf16.mxu1 %v1132_v7 }
  0x22   : > { %1050 = vmatpush3.bf16.msra.mxu0 %v1132_v7  ;;  %1100 = vmatpush3.bf16.msra.mxu1 %v1132_v7 }
  0x23   : > { %1051 = vmatprep.subr.bf16.mxu0 %v1133_v8  ;;  %1093 = vmatprep.subr.bf16.mxu1 %v1133_v8 }
  0x26   : > { %1052 = vmatpush3.bf16.msra.mxu0 %v1133_v8  ;;  %1101 = vmatpush3.bf16.msra.mxu1 %v1133_v8 }
  0x27   : > { %1053 = vmatprep.subr.bf16.mxu0 %v1134_v9  ;;  %1094 = vmatprep.subr.bf16.mxu1 %v1134_v9 }
  0x2a   : > { %1054 = vmatpush3.bf16.msra.mxu0 %v1134_v9  ;;  %1102 = vmatpush3.bf16.msra.mxu1 %v1134_v9 }
  0x2d   : > { %1056 = vmatmul.mubr.bf16.vlgmr.msra.gmra.mxu0 %v1137_v10  ;;  %1072 = vmatmul.mubr.bf16.vlgmr.msra.gmra.mxu1 %v1138_v11 }
  0x2e   : > { %1059 = vmatprep.mubr.bf16.mxu0 %v1139_v12  ;;  %1075 = vmatprep.mubr.bf16.mxu1 %v1140_v13 }
  0x35   : > { %1060 = vmatmul.mubr.bf16.gmra.mxu0 %v1141_v14  ;;  %1076 = vmatmul.mubr.bf16.gmra.mxu1 %v1142_v15 }
  0x36   : > { %1063 = vmatprep.mubr.bf16.mxu0 %v1143_v16  ;;  %1079 = vmatprep.mubr.bf16.mxu1 %v1144_v17 }
  0x3d   : > { %1064 = vmatmul.mubr.bf16.gmra.mxu0 %v1145_v18  ;;  %1080 = vmatmul.mubr.bf16.gmra.mxu1 %v1146_v19 }
  0x3e   : > { %1067 = vmatprep.mubr.bf16.mxu0 %v1147_v20  ;;  %1083 = vmatprep.mubr.bf16.mxu1 %v1148_v21 }
  0x45   : > { %1068 = vmatmul.mubr.bf16.gmra.mxu0 %v1149_v22  ;;  %1084 = vmatmul.mubr.bf16.gmra.mxu1 %v1150_v23 }
  0xed   : > { %v1057_v24 = vpop.f32.mrf.mxu0  ;;  %v1073_v25 = vpop.f32.mrf.mxu1 }
  0xee   : > { %v540_v30 = vmax.f32 %v1057_v24, 0.0  ;;  %v556_v31 = vmax.f32 %v1073_v25, 0.0 }
  0xef   : > { %v411_v26 = vpop.f32.mrf.mxu0  ;;  %v475_v27 = vpop.f32.mrf.mxu1 }
  0xf0   : > { %v538_v34 = vmax.f32 %v411_v26, 0.0  ;;  %v554_v35 = vmax.f32 %v475_v27, 0.0 }
  0xf1   : > { %v1058_v28 = vpop.f32.mrf.mxu0  ;;  %v1074_v29 = vpop.f32.mrf.mxu1 }
  0xf2   : > { %v541_v32 = vmax.f32 %v1058_v28, 0.0  ;;  %v557_v33 = vmax.f32 %v1074_v29, 0.0 }
  0xf3   : > { %v414_v36 = vpop.f32.mrf.mxu0  ;;  %v478_v37 = vpop.f32.mrf.mxu1 }
  0xf4   : > { %v928_v38 = vpack.c.bf16 %v541_v32, %v540_v30  ;;  %v968_v39 = vpack.c.bf16 %v557_v33, %v556_v31  ;;  %v539_v40 = vmax.f32 %v414_v36, 0.0  ;;  %v555_v41 = vmax.f32 %v478_v37, 0.0 }
  0xf5   : > { %v1061_v42 = vpop.f32.mrf.mxu0  ;;  %v1077_v43 = vpop.f32.mrf.mxu1 }
  0xf6   : > { %1000 = vst [vmem:[%s1263_s8 + $0x8] sm:$0xff] %v928_v38   ;;  %1008 = vst [vmem:[%s1263_s8 + $0x48] sm:$0xff] %v968_v39   ;;  %v923_v44 = vpack.c.bf16 %v539_v40, %v538_v34  ;;  %v963_v45 = vpack.c.bf16 %v555_v41, %v554_v35  ;;  %v544_v50 = vmax.f32 %v1061_v42, 0.0  ;;  %v560_v51 = vmax.f32 %v1077_v43, 0.0 }
  0xf7   : > { %v427_v46 = vpop.f32.mrf.mxu0  ;;  %v491_v47 = vpop.f32.mrf.mxu1 }
  0xf8   : > { %924 = vst [vmem:[%s1263_s8] sm:$0xff] %v923_v44   ;;  %1007 = vst [vmem:[%s1263_s8 + $0x40] sm:$0xff] %v963_v45   ;;  %v542_v54 = vmax.f32 %v427_v46, 0.0  ;;  %v558_v55 = vmax.f32 %v491_v47, 0.0 }
  0xf9   : > { %v1062_v48 = vpop.f32.mrf.mxu0  ;;  %v1078_v49 = vpop.f32.mrf.mxu1 }
  0xfa   : > { %v545_v52 = vmax.f32 %v1062_v48, 0.0  ;;  %v561_v53 = vmax.f32 %v1078_v49, 0.0 }
  0xfb   : > { %v430_v56 = vpop.f32.mrf.mxu0  ;;  %v494_v57 = vpop.f32.mrf.mxu1 }
  0xfc   : > { %v938_v58 = vpack.c.bf16 %v545_v52, %v544_v50  ;;  %v978_v59 = vpack.c.bf16 %v561_v53, %v560_v51  ;;  %v543_v60 = vmax.f32 %v430_v56, 0.0  ;;  %v559_v61 = vmax.f32 %v494_v57, 0.0 }
  0xfd   : > { %v1065_v62 = vpop.f32.mrf.mxu0  ;;  %v1081_v63 = vpop.f32.mrf.mxu1 }
  0xfe   : > { %1002 = vst [vmem:[%s1263_s8 + $0x18] sm:$0xff] %v938_v58   ;;  %1010 = vst [vmem:[%s1263_s8 + $0x58] sm:$0xff] %v978_v59   ;;  %v933_v0 = vpack.c.bf16 %v543_v60, %v542_v54  ;;  %v973_v1 = vpack.c.bf16 %v559_v61, %v558_v55  ;;  %v548_v6 = vmax.f32 %v1065_v62, 0.0  ;;  %v564_v7 = vmax.f32 %v1081_v63, 0.0 }
  0xff   : > { %v443_v2 = vpop.f32.mrf.mxu0  ;;  %v507_v3 = vpop.f32.mrf.mxu1 }
 0x100   : > { %1001 = vst [vmem:[%s1263_s8 + $0x10] sm:$0xff] %v933_v0   ;;  %1009 = vst [vmem:[%s1263_s8 + $0x50] sm:$0xff] %v973_v1   ;;  %v546_v10 = vmax.f32 %v443_v2, 0.0  ;;  %v562_v11 = vmax.f32 %v507_v3, 0.0 }
 0x101   : > { %v1066_v4 = vpop.f32.mrf.mxu0  ;;  %v1082_v5 = vpop.f32.mrf.mxu1 }
 0x102   : > { %v549_v8 = vmax.f32 %v1066_v4, 0.0  ;;  %v565_v9 = vmax.f32 %v1082_v5, 0.0 }
 0x103   : > { %v446_v12 = vpop.f32.mrf.mxu0  ;;  %v510_v13 = vpop.f32.mrf.mxu1 }
 0x104   : > { %v948_v14 = vpack.c.bf16 %v549_v8, %v548_v6  ;;  %v988_v15 = vpack.c.bf16 %v565_v9, %v564_v7  ;;  %v547_v16 = vmax.f32 %v446_v12, 0.0  ;;  %v563_v17 = vmax.f32 %v510_v13, 0.0 }
 0x105   : > { %v1069_v18 = vpop.f32.mrf.mxu0  ;;  %v1085_v19 = vpop.f32.mrf.mxu1 }
 0x106   : > { %1004 = vst [vmem:[%s1263_s8 + $0x28] sm:$0xff] %v948_v14   ;;  %1012 = vst [vmem:[%s1263_s8 + $0x68] sm:$0xff] %v988_v15   ;;  %v943_v20 = vpack.c.bf16 %v547_v16, %v546_v10  ;;  %v983_v21 = vpack.c.bf16 %v563_v17, %v562_v11  ;;  %v552_v26 = vmax.f32 %v1069_v18, 0.0  ;;  %v568_v27 = vmax.f32 %v1085_v19, 0.0 }
 0x107   : > { %v459_v22 = vpop.f32.mrf.mxu0  ;;  %v523_v23 = vpop.f32.mrf.mxu1 }
 0x108   : > { %1003 = vst [vmem:[%s1263_s8 + $0x20] sm:$0xff] %v943_v20   ;;  %1011 = vst [vmem:[%s1263_s8 + $0x60] sm:$0xff] %v983_v21   ;;  %v550_v30 = vmax.f32 %v459_v22, 0.0  ;;  %v566_v31 = vmax.f32 %v523_v23, 0.0 }
 0x109   : > { %v1070_v24 = vpop.f32.mrf.mxu0  ;;  %v1086_v25 = vpop.f32.mrf.mxu1 }
 0x10a   : > { %v553_v28 = vmax.f32 %v1070_v24, 0.0  ;;  %v569_v29 = vmax.f32 %v1086_v25, 0.0 }
 0x10b   : > { %v462_v32 = vpop.f32.mrf.mxu0  ;;  %v526_v33 = vpop.f32.mrf.mxu1 }
 0x10c   : > { %v958_v34 = vpack.c.bf16 %v553_v28, %v552_v26  ;;  %v998_v35 = vpack.c.bf16 %v569_v29, %v568_v27  ;;  %v551_v36 = vmax.f32 %v462_v32, 0.0  ;;  %v567_v37 = vmax.f32 %v526_v33, 0.0 }
 0x10e   : > { %1006 = vst [vmem:[%s1263_s8 + $0x38] sm:$0xff] %v958_v34   ;;  %1014 = vst [vmem:[%s1263_s8 + $0x78] sm:$0xff] %v998_v35   ;;  %v953_v38 = vpack.c.bf16 %v551_v36, %v550_v30  ;;  %v993_v39 = vpack.c.bf16 %v567_v37, %v566_v31 }
 0x110   : > { %1005 = vst [vmem:[%s1263_s8 + $0x30] sm:$0xff] %v953_v38   ;;  %1013 = vst [vmem:[%s1263_s8 + $0x70] sm:$0xff] %v993_v39  }
 0x111 PF: > { %s12_s11 = sadd.s32 1, %s1173_s11   ;;  %s1293_s9 = smov %s1169_s10 }
 0x112   : > { %p9_p5 = scmp.ge.s32.totalorder %s12_s11, 4   ;;  %s1294_s10 = smov %s1296_s12 }
 0x114   :  { %11 = sbr.rel (!%p9_p5) target bundleno = 2 (0x2), region = 61 }

// kernel: _lambda_.9
= control target key start
LH: loop header
LB: loop body
LE: loop exit
PB: predicated region body
PF: predicated region fallthrough
CT: control target
= control target key end

     0   :  { %vm377_vm0 = vcmask 1040384   ;;  %s658_s1 = inlined_call_operand.vmem [shape: bf16[128,128], index: 1, kind: input, shape index: {}]   ;;  %s659_s0 = inlined_call_operand.vmem [shape: bf16[128,128], index: 0, kind: input, shape index: {}]   ;;  %s660_s2 = inlined_call_operand.vmem [shape: bf16[128,128], index: 2, kind: output, shape index: {0}]   ;;  %s661_s3 = inlined_call_operand.vmem [shape: f32[1,2,128], index: 3, kind: output, shape index: {1}]  }
   0x1   :  { %v547_v0 = vld [vmem:[%s658_s1 + $0x38] sm:$0xff]   ;;  %v548_v1 = vld [vmem:[%s658_s1 + $0x30] sm:$0xff]   ;;  %v549_v2 = vld [vmem:[%s658_s1 + $0x28] sm:$0xff]  }
   0x2   :  { %499 = vmatprep.subr.bf16.mxu0 %v547_v0  ;;  %531 = vmatprep.subr.bf16.mxu1 %v547_v0  ;;  %v550_v3 = vld [vmem:[%s658_s1 + $0x20] sm:$0xff]   ;;  %v551_v5 = vld [vmem:[%s658_s1 + $0x18] sm:$0xff]   ;;  %v552_v7 = vld [vmem:[%s658_s1 + $0x10] sm:$0xff]  }
   0x3   :  { %500 = vmatpush3.bf16.msra.mxu0 %v547_v0  ;;  %539 = vmatpush3.bf16.msra.mxu1 %v547_v0  ;;  %v555_v4 = vld [vmem:[%s659_s0] sm:$0xff]   ;;  %v553_v8 = vld [vmem:[%s658_s1 + $0x8] sm:$0xff]   ;;  %v557_v12 = vld [vmem:[%s659_s0 + $0x10] sm:$0xff]  }
   0x4   :  { %501 = vmatprep.subr.bf16.mxu0 %v548_v1  ;;  %532 = vmatprep.subr.bf16.mxu1 %v548_v1  ;;  %v559_v6 = vld [vmem:[%s659_s0 + $0x20] sm:$0xff]   ;;  %v556_v10 = vld [vmem:[%s659_s0 + $0x8] sm:$0xff]   ;;  %v561_v13 = vld [vmem:[%s659_s0 + $0x30] sm:$0xff]  }
   0x5   :  { %515 = vmatprep.mubr.bf16.mxu0 %v555_v4  ;;  %523 = vmatprep.mubr.bf16.mxu1 %v559_v6  ;;  %v554_v9 = vld [vmem:[%s658_s1] sm:$0xff]   ;;  %v560_v11 = vld [vmem:[%s659_s0 + $0x28] sm:$0xff]   ;;  %v558_v14 = vld [vmem:[%s659_s0 + $0x18] sm:$0xff]  }
   0x6   :  { %v562_v15 = vld [vmem:[%s659_s0 + $0x38] sm:$0xff]  }
   0x7   :  { %502 = vmatpush3.bf16.msra.mxu0 %v548_v1  ;;  %540 = vmatpush3.bf16.msra.mxu1 %v548_v1 }
   0x8   :  { %503 = vmatprep.subr.bf16.mxu0 %v549_v2  ;;  %533 = vmatprep.subr.bf16.mxu1 %v549_v2 }
   0xb   :  { %504 = vmatpush3.bf16.msra.mxu0 %v549_v2  ;;  %541 = vmatpush3.bf16.msra.mxu1 %v549_v2 }
   0xc   :  { %505 = vmatprep.subr.bf16.mxu0 %v550_v3  ;;  %534 = vmatprep.subr.bf16.mxu1 %v550_v3 }
   0xf   :  { %506 = vmatpush3.bf16.msra.mxu0 %v550_v3  ;;  %542 = vmatpush3.bf16.msra.mxu1 %v550_v3 }
  0x10   :  { %507 = vmatprep.subr.bf16.mxu0 %v551_v5  ;;  %535 = vmatprep.subr.bf16.mxu1 %v551_v5 }
  0x13   :  { %508 = vmatpush3.bf16.msra.mxu0 %v551_v5  ;;  %543 = vmatpush3.bf16.msra.mxu1 %v551_v5 }
  0x14   :  { %509 = vmatprep.subr.bf16.mxu0 %v552_v7  ;;  %536 = vmatprep.subr.bf16.mxu1 %v552_v7 }
  0x17   :  { %510 = vmatpush3.bf16.msra.mxu0 %v552_v7  ;;  %544 = vmatpush3.bf16.msra.mxu1 %v552_v7 }
  0x18   :  { %511 = vmatprep.subr.bf16.mxu0 %v553_v8  ;;  %537 = vmatprep.subr.bf16.mxu1 %v553_v8 }
  0x1b   :  { %512 = vmatpush3.bf16.msra.mxu0 %v553_v8  ;;  %545 = vmatpush3.bf16.msra.mxu1 %v553_v8 }
  0x1c   :  { %513 = vmatprep.subr.bf16.mxu0 %v554_v9  ;;  %538 = vmatprep.subr.bf16.mxu1 %v554_v9 }
  0x1f   :  { %514 = vmatpush3.bf16.msra.mxu0 %v554_v9  ;;  %546 = vmatpush3.bf16.msra.mxu1 %v554_v9 }
  0x22   :  { %516 = vmatmul.mubr.bf16.vlgmr.msra.gmra.mxu0 %v556_v10  ;;  %524 = vmatmul.mubr.bf16.vlgmr.msra.gmra.mxu1 %v560_v11 }
  0x23   :  { %519 = vmatprep.mubr.bf16.mxu0 %v557_v12  ;;  %527 = vmatprep.mubr.bf16.mxu1 %v561_v13 }
  0x2a   :  { %520 = vmatmul.mubr.bf16.gmra.mxu0 %v558_v14  ;;  %528 = vmatmul.mubr.bf16.gmra.mxu1 %v562_v15 }
  0xe2   :  { %v517_v16 = vpop.f32.mrf.mxu0  ;;  %v525_v17 = vpop.f32.mrf.mxu1 }
  0xe3   :  { %v342_v33 = vmul.f32 %v517_v16, %v517_v16  ;;  %v350_v3 = vmul.f32 %v525_v17, %v525_v17 }
  0xe4   :  { %v176_v18 = vpop.f32.mrf.mxu0  ;;  %v208_v19 = vpop.f32.mrf.mxu1 }
  0xe5   :  { %v340_v24 = vmul.f32 %v176_v18, %v176_v18  ;;  %v348_v61 = vmul.f32 %v208_v19, %v208_v19 }
  0xe6   :  { %v518_v20 = vpop.f32.mrf.mxu0  ;;  %v526_v21 = vpop.f32.mrf.mxu1 }
  0xe7   :  { %v444_v22 = vpack.c.bf16 %v518_v20, %v517_v16  ;;  %v464_v23 = vpack.c.bf16 %v526_v21, %v525_v17  ;;  %v343_v38 = vmul.f32 %v518_v20, %v518_v20  ;;  %v351_v6 = vmul.f32 %v526_v21, %v526_v21 }
  0xe8   :  { %v179_v25 = vpop.f32.mrf.mxu0  ;;  %v211_v26 = vpop.f32.mrf.mxu1 }
  0xe9   :  { %476 = vst [vmem:[%s660_s2 + $0x8] sm:$0xff] %v444_v22   ;;  %v439_v27 = vpack.c.bf16 %v179_v25, %v176_v18  ;;  %v319_v28 = vadd.f32 %v179_v25, %v176_v18  ;;  %v341_v29 = vmul.f32 %v179_v25, %v179_v25  ;;  %480 = vst [vmem:[%s660_s2 + $0x28] sm:$0xff] %v464_v23  }
  0xea   :  { %v459_v30 = vpack.c.bf16 %v211_v26, %v208_v19  ;;  %v521_v31 = vpop.f32.mrf.mxu0  ;;  %v529_v32 = vpop.f32.mrf.mxu1  ;;  %v349_v1 = vmul.f32 %v211_v26, %v211_v26 }
  0xeb   :  { %440 = vst [vmem:[%s660_s2] sm:$0xff] %v439_v27   ;;  %v320_v34 = vadd.f32 %v517_v16, %v319_v28  ;;  %v356_v35 = vadd.f32 %v341_v29, %v340_v24  ;;  %v346_v55 = vmul.f32 %v521_v31, %v521_v31  ;;  %v354_v15 = vmul.f32 %v529_v32, %v529_v32 }
  0xec   :  { %479 = vst [vmem:[%s660_s2 + $0x20] sm:$0xff] %v459_v30   ;;  %v192_v36 = vpop.f32.mrf.mxu0  ;;  %v224_v37 = vpop.f32.mrf.mxu1 }
  0xed   :  { %v357_v39 = vadd.f32 %v356_v35, %v342_v33  ;;  %v321_v40 = vadd.f32 %v518_v20, %v320_v34  ;;  %v344_v44 = vmul.f32 %v192_v36, %v192_v36  ;;  %v352_v10 = vmul.f32 %v224_v37, %v224_v37 }
  0xee   :  { %v522_v41 = vpop.f32.mrf.mxu0  ;;  %v530_v42 = vpop.f32.mrf.mxu1 }
  0xef   :  { %v322_v43 = vadd.f32 %v321_v40, %v192_v36  ;;  %v358_v45 = vadd.f32 %v357_v39, %v343_v38  ;;  %v454_v46 = vpack.c.bf16 %v522_v41, %v521_v31  ;;  %v474_v48 = vpack.c.bf16 %v530_v42, %v529_v32 }
  0xf0   :  { %v195_v47 = vpop.f32.mrf.mxu0  ;;  %v227_v49 = vpop.f32.mrf.mxu1  ;;  %v347_v58 = vmul.f32 %v522_v41, %v522_v41  ;;  %v355_v20 = vmul.f32 %v530_v42, %v530_v42 }
  0xf1   :  { %v359_v50 = vadd.f32 %v358_v45, %v344_v44  ;;  %478 = vst [vmem:[%s660_s2 + $0x18] sm:$0xff] %v454_v46   ;;  %v449_v51 = vpack.c.bf16 %v195_v47, %v192_v36  ;;  %v323_v52 = vadd.f32 %v322_v43, %v195_v47  ;;  %v345_v53 = vmul.f32 %v195_v47, %v195_v47 }
  0xf2   :  { %482 = vst [vmem:[%s660_s2 + $0x38] sm:$0xff] %v474_v48   ;;  %v469_v54 = vpack.c.bf16 %v227_v49, %v224_v37  ;;  %v353_v14 = vmul.f32 %v227_v49, %v227_v49 }
  0xf3   :  { %477 = vst [vmem:[%s660_s2 + $0x10] sm:$0xff] %v449_v51   ;;  %v324_v56 = vadd.f32 %v521_v31, %v323_v52  ;;  %v360_v57 = vadd.f32 %v359_v50, %v345_v53 }
  0xf4   :  { %481 = vst [vmem:[%s660_s2 + $0x30] sm:$0xff] %v469_v54  }
  0xf5   :  { %v325_v59 = vadd.f32 %v522_v41, %v324_v56  ;;  %v361_v60 = vadd.f32 %v360_v57, %v346_v55 }
  0xf7   :  { %v362_v62 = vadd.f32 %v361_v60, %v347_v58  ;;  %v326_v63 = vadd.f32 %v325_v59, %v208_v19 }
  0xf9   :  { %v327_v0 = vadd.f32 %v326_v63, %v211_v26  ;;  %v363_v2 = vadd.f32 %v362_v62, %v348_v61 }
  0xfb   :  { %v328_v4 = vadd.f32 %v525_v17, %v327_v0  ;;  %v364_v5 = vadd.f32 %v363_v2, %v349_v1 }
  0xfd   :  { %v365_v7 = vadd.f32 %v364_v5, %v350_v3  ;;  %v329_v8 = vadd.f32 %v526_v21, %v328_v4 }
  0xff   :  { %v330_v9 = vadd.f32 %v329_v8, %v224_v37  ;;  %v366_v11 = vadd.f32 %v365_v7, %v351_v6 }
 0x101   :  { %v367_v12 = vadd.f32 %v366_v11, %v352_v10  ;;  %v331_v13 = vadd.f32 %v330_v9, %v227_v49 }
 0x103   :  { %v332_v16 = vadd.f32 %v529_v32, %v331_v13  ;;  %v368_v18 = vadd.f32 %v367_v12, %v353_v14 }
 0x105   :  { %v333_v19 = vadd.f32 %v530_v42, %v332_v16  ;;  %v369_v22 = vadd.f32 %v368_v18, %v354_v15 }
 0x107   :  { %v334_v23 = vrot.slane %v333_v19, 4  ;;  %v370_v24 = vadd.f32 %v369_v22, %v355_v20 }
 0x109   :  { %v335_v25 = vadd.f32 %v334_v23, %v333_v19  ;;  %v371_v17 = vrot.slane %v370_v24, 4 }
 0x10b   :  { %v336_v26 = vrot.slane %v335_v25, 2  ;;  %v372_v27 = vadd.f32 %v371_v17, %v370_v24 }
 0x10d   :  { %v337_v28 = vadd.f32 %v336_v26, %v335_v25  ;;  %v373_v21 = vrot.slane %v372_v27, 2 }
 0x10f   :  { %v338_v29 = vrot.slane %v337_v28, 1  ;;  %v374_v30 = vadd.f32 %v373_v21, %v372_v27 }
 0x111   :  { %v375_v31 = vrot.slane %v374_v30, 1  ;;  %v339_v33 = vadd.f32 %v338_v29, %v337_v28 }
 0x113   :  { %v376_v34 = vadd.f32 %v375_v31, %v374_v30 }
 0x115   :  { %v378_v35 = vsel %vm377_vm0, %v339_v33, %v376_v34 }
 0x116   :  { %379 = vst [vmem:[%s661_s3] sm:$0x3] %v378_v35 }

// kernel: _lambda_.10
= control target key start
LH: loop header
LB: loop body
LE: loop exit
PB: predicated region body
PF: predicated region fallthrough
CT: control target
= control target key end

     0   :  { %s422_s0 = inlined_call_operand.vmem [shape: bf16[128,128], index: 0, kind: input, shape index: {}]   ;;  %s423_s1 = inlined_call_operand.vmem [shape: f32[1,128], index: 1, kind: input, shape index: {}]   ;;  %s424_s2 = inlined_call_operand.vmem [shape: f32[1,128], index: 2, kind: input, shape index: {}]   ;;  %s425_s3 = inlined_call_operand.vmem [shape: bf16[128,128], index: 3, kind: output, shape index: {}]  }
   0x1   :  { %v227_v0 = vld [vmem:[%s422_s0] sm:$0xff]   ;;  %v298_v4 = vld [vmem:[%s422_s0 + $0x8] sm:$0xff]   ;;  %v299_v5 = vld [vmem:[%s422_s0 + $0x10] sm:$0xff]  }
   0x2   :  { %v338_v1 = vld [vmem:[%s423_s1] ss:$0 sm:$0xff]  ;;  %v228_v2 = vunpack.c.l.bf16 %v227_v0  ;;  %v229_v3 = vunpack.c.h.bf16 %v227_v0  ;;  %v300_v6 = vld [vmem:[%s422_s0 + $0x18] sm:$0xff]   ;;  %v232_v8 = vunpack.c.l.bf16 %v298_v4  ;;  %v233_v9 = vunpack.c.h.bf16 %v298_v4  ;;  %v302_v33 = vld [vmem:[%s422_s0 + $0x28] sm:$0xff]  }
   0x3   :  { %v352_v7 = vld [vmem:[%s424_s2] ss:$0 sm:$0xff]  ;;  %v236_v10 = vunpack.c.l.bf16 %v299_v5  ;;  %v237_v11 = vunpack.c.h.bf16 %v299_v5  ;;  %v240_v14 = vunpack.c.l.bf16 %v300_v6  ;;  %v241_v15 = vunpack.c.h.bf16 %v300_v6  ;;  %v303_v38 = vld [vmem:[%s422_s0 + $0x30] sm:$0xff]   ;;  %v304_v43 = vld [vmem:[%s422_s0 + $0x38] sm:$0xff]  }
   0x4   :  { %v53_v12 = vmul.f32 %v228_v2, %v338_v1  ;;  %v54_v13 = vmul.f32 %v229_v3, %v338_v1  ;;  %v55_v16 = vmul.f32 %v232_v8, %v338_v1  ;;  %v56_v17 = vmul.f32 %v233_v9, %v338_v1  ;;  %v301_v28 = vld [vmem:[%s422_s0 + $0x20] sm:$0xff]  }
   0x5   :  { %v57_v18 = vmul.f32 %v236_v10, %v338_v1  ;;  %v58_v19 = vmul.f32 %v237_v11, %v338_v1  ;;  %v59_v22 = vmul.f32 %v240_v14, %v338_v1  ;;  %v60_v23 = vmul.f32 %v241_v15, %v338_v1 }
   0x6   :  { %v76_v20 = vadd.f32 %v352_v7, %v53_v12  ;;  %v77_v21 = vadd.f32 %v352_v7, %v54_v13  ;;  %v78_v24 = vadd.f32 %v352_v7, %v55_v16  ;;  %v79_v25 = vadd.f32 %v352_v7, %v56_v17 }
   0x7   :  { %v80_v26 = vadd.f32 %v352_v7, %v57_v18  ;;  %v81_v27 = vadd.f32 %v352_v7, %v58_v19  ;;  %v82_v31 = vadd.f32 %v352_v7, %v59_v22  ;;  %v83_v32 = vadd.f32 %v352_v7, %v60_v23 }
   0x8   :  { %v92_v29 = vmax.f32 %v76_v20, 0.0  ;;  %v93_v30 = vmax.f32 %v77_v21, 0.0  ;;  %v94_v34 = vmax.f32 %v78_v24, 0.0  ;;  %v95_v35 = vmax.f32 %v79_v25, 0.0 }
   0x9   :  { %v96_v36 = vmax.f32 %v80_v26, 0.0  ;;  %v97_v37 = vmax.f32 %v81_v27, 0.0  ;;  %v98_v40 = vmax.f32 %v82_v31, 0.0  ;;  %v99_v41 = vmax.f32 %v83_v32, 0.0 }
   0xa   :  { %v261_v39 = vpack.c.bf16 %v93_v30, %v92_v29  ;;  %v244_v42 = vunpack.c.l.bf16 %v301_v28  ;;  %v266_v44 = vpack.c.bf16 %v95_v35, %v94_v34  ;;  %v245_v46 = vunpack.c.h.bf16 %v301_v28 }
   0xb   :  { %v271_v45 = vpack.c.bf16 %v97_v37, %v96_v36  ;;  %v248_v47 = vunpack.c.l.bf16 %v302_v33  ;;  %v276_v48 = vpack.c.bf16 %v99_v41, %v98_v40  ;;  %v249_v50 = vunpack.c.h.bf16 %v302_v33 }
   0xc   :  { %262 = vst [vmem:[%s425_s3] sm:$0xff] %v261_v39   ;;  %v61_v49 = vmul.f32 %v244_v42, %v338_v1  ;;  %v252_v51 = vunpack.c.l.bf16 %v303_v38  ;;  %305 = vst [vmem:[%s425_s3 + $0x8] sm:$0xff] %v266_v44   ;;  %v62_v52 = vmul.f32 %v245_v46, %v338_v1  ;;  %v253_v54 = vunpack.c.h.bf16 %v303_v38 }
   0xd   :  { %306 = vst [vmem:[%s425_s3 + $0x10] sm:$0xff] %v271_v45   ;;  %v63_v53 = vmul.f32 %v248_v47, %v338_v1  ;;  %v256_v55 = vunpack.c.l.bf16 %v304_v43  ;;  %307 = vst [vmem:[%s425_s3 + $0x18] sm:$0xff] %v276_v48   ;;  %v64_v57 = vmul.f32 %v249_v50, %v338_v1  ;;  %v257_v59 = vunpack.c.h.bf16 %v304_v43 }
   0xe   :  { %v84_v56 = vadd.f32 %v352_v7, %v61_v49  ;;  %v65_v58 = vmul.f32 %v252_v51, %v338_v1  ;;  %v85_v60 = vadd.f32 %v352_v7, %v62_v52  ;;  %v66_v62 = vmul.f32 %v253_v54, %v338_v1 }
   0xf   :  { %v86_v61 = vadd.f32 %v352_v7, %v63_v53  ;;  %v67_v63 = vmul.f32 %v256_v55, %v338_v1  ;;  %v87_v2 = vadd.f32 %v352_v7, %v64_v57  ;;  %v68_v4 = vmul.f32 %v257_v59, %v338_v1 }
  0x10   :  { %v100_v0 = vmax.f32 %v84_v56, 0.0  ;;  %v88_v3 = vadd.f32 %v352_v7, %v65_v58  ;;  %v101_v5 = vmax.f32 %v85_v60, 0.0  ;;  %v89_v8 = vadd.f32 %v352_v7, %v66_v62 }
  0x11   :  { %v102_v6 = vmax.f32 %v86_v61, 0.0  ;;  %v90_v9 = vadd.f32 %v352_v7, %v67_v63  ;;  %v103_v10 = vmax.f32 %v87_v2, 0.0  ;;  %v91_v12 = vadd.f32 %v352_v7, %v68_v4 }
  0x12   :  { %v104_v11 = vmax.f32 %v88_v3, 0.0  ;;  %v281_v13 = vpack.c.bf16 %v101_v5, %v100_v0  ;;  %v105_v14 = vmax.f32 %v89_v8, 0.0 }
  0x13   :  { %v106_v15 = vmax.f32 %v90_v9, 0.0  ;;  %v286_v16 = vpack.c.bf16 %v103_v10, %v102_v6  ;;  %v107_v17 = vmax.f32 %v91_v12, 0.0 }
  0x14   :  { %308 = vst [vmem:[%s425_s3 + $0x20] sm:$0xff] %v281_v13   ;;  %v291_v1 = vpack.c.bf16 %v105_v14, %v104_v11 }
  0x15   :  { %309 = vst [vmem:[%s425_s3 + $0x28] sm:$0xff] %v286_v16   ;;  %v296_v18 = vpack.c.bf16 %v107_v17, %v106_v15 }
  0x16   :  { %310 = vst [vmem:[%s425_s3 + $0x30] sm:$0xff] %v291_v1  }
  0x17   :  { %311 = vst [vmem:[%s425_s3 + $0x38] sm:$0xff] %v296_v18  }

// kernel: _lambda_.11
= control target key start
LH: loop header
LB: loop body
LE: loop exit
PB: predicated region body
PF: predicated region fallthrough
CT: control target
= control target key end

     0   :  { %vm257_vm0 = vcmask 1040384   ;;  %s462_s1 = inlined_call_operand.vmem [shape: bf16[256,128], index: 1, kind: input, shape index: {}]   ;;  %s463_s0 = inlined_call_operand.vmem [shape: bf16[32,256], index: 0, kind: input, shape index: {}]   ;;  %s464_s2 = inlined_call_operand.vmem [shape: bf16[32,128], index: 2, kind: output, shape index: {0}]   ;;  %s465_s3 = inlined_call_operand.vmem [shape: f32[1,2,128], index: 3, kind: output, shape index: {1}]  }
   0x1   :  { %v351_v0 = vld [vmem:[%s462_s1 + $0x78] sm:$0xff]   ;;  %v353_v2 = vld [vmem:[%s462_s1 + $0x70] sm:$0xff]   ;;  %v355_v4 = vld [vmem:[%s462_s1 + $0x68] sm:$0xff]  }
   0x2   :  { %v352_v1 = vld [vmem:[%s462_s1 + $0x38] sm:$0xff]   ;;  %307 = vmatprep.subr.bf16.mxu0 %v351_v0  ;;  %335 = vmatprep.subr.bf16.mxu1 %v351_v0  ;;  %v354_v3 = vld [vmem:[%s462_s1 + $0x30] sm:$0xff]   ;;  %v356_v5 = vld [vmem:[%s462_s1 + $0x28] sm:$0xff]  }
   0x3   :  { %308 = vmatpush3.bf16.msra.mxu0 %v352_v1  ;;  %343 = vmatpush3.bf16.msra.mxu1 %v352_v1  ;;  %v357_v6 = vld [vmem:[%s462_s1 + $0x60] sm:$0xff]   ;;  %v359_v8 = vld [vmem:[%s462_s1 + $0x58] sm:$0xff]   ;;  %v361_v10 = vld [vmem:[%s462_s1 + $0x50] sm:$0xff]  }
   0x4   :  { %309 = vmatprep.subr.bf16.mxu0 %v353_v2  ;;  %336 = vmatprep.subr.bf16.mxu1 %v353_v2  ;;  %v358_v7 = vld [vmem:[%s462_s1 + $0x20] sm:$0xff]   ;;  %v360_v9 = vld [vmem:[%s462_s1 + $0x18] sm:$0xff]   ;;  %v362_v13 = vld [vmem:[%s462_s1 + $0x10] sm:$0xff]  }
   0x5   :  { %v369_v11 = vld [vmem:[%s463_s0 + $0x4] ss:$8 sps:$4 sm:$0xff]   ;;  %v372_v12 = vld [vmem:[%s463_s0 + $0x14] ss:$8 sps:$4 sm:$0xff]   ;;  %v367_v18 = vld [vmem:[%s463_s0] ss:$8 sps:$4 sm:$0xff]  }
   0x6   :  { %v363_v14 = vld [vmem:[%s462_s1 + $0x48] sm:$0xff]   ;;  %198 = vmatprep.mubr.bf16.mxu0 %v369_v11  ;;  %206 = vmatprep.mubr.bf16.mxu1 %v372_v12  ;;  %v365_v16 = vld [vmem:[%s462_s1 + $0x40] sm:$0xff]   ;;  %v370_v19 = vld [vmem:[%s463_s0 + $0x10] ss:$8 sps:$4 sm:$0xff]  }
   0x7   :  { %310 = vmatpush3.bf16.msra.mxu0 %v354_v3  ;;  %344 = vmatpush3.bf16.msra.mxu1 %v354_v3  ;;  %v364_v15 = vld [vmem:[%s462_s1 + $0x8] sm:$0xff]   ;;  %v366_v17 = vld [vmem:[%s462_s1] sm:$0xff]  }
   0x8   :  { %311 = vmatprep.subr.bf16.mxu0 %v355_v4  ;;  %337 = vmatprep.subr.bf16.mxu1 %v355_v4 }
   0xb   :  { %312 = vmatpush3.bf16.msra.mxu0 %v356_v5  ;;  %345 = vmatpush3.bf16.msra.mxu1 %v356_v5 }
   0xc   :  { %313 = vmatprep.subr.bf16.mxu0 %v357_v6  ;;  %338 = vmatprep.subr.bf16.mxu1 %v357_v6 }
   0xf   :  { %314 = vmatpush3.bf16.msra.mxu0 %v358_v7  ;;  %346 = vmatpush3.bf16.msra.mxu1 %v358_v7 }
  0x10   :  { %315 = vmatprep.subr.bf16.mxu0 %v359_v8  ;;  %339 = vmatprep.subr.bf16.mxu1 %v359_v8 }
  0x13   :  { %316 = vmatpush3.bf16.msra.mxu0 %v360_v9  ;;  %347 = vmatpush3.bf16.msra.mxu1 %v360_v9 }
  0x14   :  { %317 = vmatprep.subr.bf16.mxu0 %v361_v10  ;;  %340 = vmatprep.subr.bf16.mxu1 %v361_v10 }
  0x17   :  { %318 = vmatpush3.bf16.msra.mxu0 %v362_v13  ;;  %348 = vmatpush3.bf16.msra.mxu1 %v362_v13 }
  0x18   :  { %319 = vmatprep.subr.bf16.mxu0 %v363_v14  ;;  %341 = vmatprep.subr.bf16.mxu1 %v363_v14 }
  0x1b   :  { %320 = vmatpush3.bf16.msra.mxu0 %v364_v15  ;;  %349 = vmatpush3.bf16.msra.mxu1 %v364_v15 }
  0x1c   :  { %321 = vmatprep.subr.bf16.mxu0 %v365_v16  ;;  %342 = vmatprep.subr.bf16.mxu1 %v365_v16 }
  0x1f   :  { %322 = vmatpush3.bf16.msra.mxu0 %v366_v17  ;;  %350 = vmatpush3.bf16.msra.mxu1 %v366_v17 }
  0x22   :  { %199 = vmatmul.mubr.bf16.vlgmr.msra.gmra.mxu0 %v367_v18  ;;  %207 = vmatmul.mubr.bf16.vlgmr.msra.gmra.mxu1 %v370_v19 }
  0xe2   :  { %v323_v20 = vpop.f32.mrf.mxu0  ;;  %v329_v21 = vpop.f32.mrf.mxu1 }
  0xe4   :  { %v324_v22 = vpop.f32.mrf.mxu0  ;;  %v330_v23 = vpop.f32.mrf.mxu1 }
  0xe5   :  { %v325_v24 = vadd.f32 %v324_v22, %v323_v20  ;;  %v331_v29 = vadd.f32 %v330_v23, %v329_v21 }
  0xe6   :  { %v326_v25 = vpop.f32.mrf.mxu0  ;;  %v332_v26 = vpop.f32.mrf.mxu1 }
  0xe7   :  { %v244_v32 = vmul.f32 %v325_v24, %v325_v24  ;;  %v246_v37 = vmul.f32 %v331_v29, %v331_v29 }
  0xe8   :  { %v327_v27 = vpop.f32.mrf.mxu0  ;;  %v333_v28 = vpop.f32.mrf.mxu1 }
  0xe9   :  { %v328_v30 = vadd.f32 %v327_v27, %v326_v25  ;;  %v334_v31 = vadd.f32 %v333_v28, %v332_v26 }
  0xeb   :  { %v299_v33 = vpack.c.bf16 %v328_v30, %v325_v24  ;;  %v235_v34 = vadd.f32 %v328_v30, %v325_v24  ;;  %v245_v35 = vmul.f32 %v328_v30, %v328_v30  ;;  %v304_v36 = vpack.c.bf16 %v334_v31, %v331_v29 }
  0xec   :  { %v247_v41 = vmul.f32 %v334_v31, %v334_v31 }
  0xed   :  { %300 = vst [vmem:[%s464_s2] sm:$0xff] %v299_v33   ;;  %v248_v38 = vadd.f32 %v245_v35, %v244_v32  ;;  %306 = vst [vmem:[%s464_s2 + $0x8] sm:$0xff] %v304_v36   ;;  %v236_v39 = vadd.f32 %v331_v29, %v235_v34 }
  0xef   :  { %v237_v40 = vadd.f32 %v334_v31, %v236_v39  ;;  %v249_v42 = vadd.f32 %v248_v38, %v246_v37 }
  0xf1   :  { %v238_v43 = vrot.slane %v237_v40, 4  ;;  %v250_v44 = vadd.f32 %v249_v42, %v247_v41 }
  0xf3   :  { %v239_v45 = vadd.f32 %v238_v43, %v237_v40  ;;  %v251_v46 = vrot.slane %v250_v44, 4 }
  0xf5   :  { %v240_v47 = vrot.slane %v239_v45, 2  ;;  %v252_v48 = vadd.f32 %v251_v46, %v250_v44 }
  0xf7   :  { %v241_v49 = vadd.f32 %v240_v47, %v239_v45  ;;  %v253_v50 = vrot.slane %v252_v48, 2 }
  0xf9   :  { %v242_v51 = vrot.slane %v241_v49, 1  ;;  %v254_v52 = vadd.f32 %v253_v50, %v252_v48 }
  0xfb   :  { %v255_v53 = vrot.slane %v254_v52, 1  ;;  %v243_v54 = vadd.f32 %v242_v51, %v241_v49 }
  0xfd   :  { %v256_v55 = vadd.f32 %v255_v53, %v254_v52 }
  0xff   :  { %v258_v56 = vsel %vm257_vm0, %v243_v54, %v256_v55 }
 0x100   :  { %259 = vst [vmem:[%s465_s3] sm:$0x3] %v258_v56 }

// kernel: _lambda_.12
= control target key start
LH: loop header
LB: loop body
LE: loop exit
PB: predicated region body
PF: predicated region fallthrough
CT: control target
= control target key end

     0   :  { %s140_s0 = inlined_call_operand.vmem [shape: bf16[32,128], index: 0, kind: input, shape index: {}]   ;;  %s141_s1 = inlined_call_operand.vmem [shape: f32[1,128], index: 1, kind: input, shape index: {}]   ;;  %s142_s2 = inlined_call_operand.vmem [shape: f32[1,128], index: 2, kind: input, shape index: {}]   ;;  %s143_s3 = inlined_call_operand.vmem [shape: bf16[32,128], index: 3, kind: output, shape index: {}]  }
   0x1   :  { %v83_v0 = vld [vmem:[%s140_s0] sm:$0xff]   ;;  %v100_v4 = vld [vmem:[%s140_s0 + $0x8] sm:$0xff]  }
   0x2   :  { %v72_v1 = vld [vmem:[%s141_s1] ss:$0 sm:$0xff]  ;;  %v84_v2 = vunpack.c.l.bf16 %v83_v0  ;;  %v85_v3 = vunpack.c.h.bf16 %v83_v0  ;;  %v88_v6 = vunpack.c.l.bf16 %v100_v4  ;;  %v89_v7 = vunpack.c.h.bf16 %v100_v4 }
   0x3   :  { %v73_v5 = vld [vmem:[%s142_s2] ss:$0 sm:$0xff] }
   0x4   :  { %v29_v8 = vmul.f32 %v84_v2, %v72_v1  ;;  %v30_v9 = vmul.f32 %v85_v3, %v72_v1  ;;  %v31_v10 = vmul.f32 %v88_v6, %v72_v1  ;;  %v32_v11 = vmul.f32 %v89_v7, %v72_v1 }
   0x6   :  { %v40_v12 = vadd.f32 %v73_v5, %v29_v8  ;;  %v41_v13 = vadd.f32 %v73_v5, %v30_v9  ;;  %v42_v14 = vadd.f32 %v73_v5, %v31_v10  ;;  %v43_v15 = vadd.f32 %v73_v5, %v32_v11 }
   0x8   :  { %v44_v16 = vmax.f32 %v40_v12, 0.0  ;;  %v45_v17 = vmax.f32 %v41_v13, 0.0  ;;  %v46_v18 = vmax.f32 %v42_v14, 0.0  ;;  %v47_v19 = vmax.f32 %v43_v15, 0.0 }
   0xa   :  { %v93_v20 = vpack.c.bf16 %v45_v17, %v44_v16  ;;  %v98_v21 = vpack.c.bf16 %v47_v19, %v46_v18 }
   0xc   :  { %94 = vst [vmem:[%s143_s3] sm:$0xff] %v93_v20   ;;  %101 = vst [vmem:[%s143_s3 + $0x8] sm:$0xff] %v98_v21  }

// kernel: _lambda_.14
= control target key start
LH: loop header
LB: loop body
LE: loop exit
PB: predicated region body
PF: predicated region fallthrough
CT: control target
= control target key end

     0   :  { %s73_s0 = inlined_call_operand.vmem [shape: bf16[8,128], index: 0, kind: input, shape index: {}]   ;;  %s74_s1 = inlined_call_operand.vmem [shape: f32[1,128], index: 1, kind: input, shape index: {}]   ;;  %s75_s2 = inlined_call_operand.vmem [shape: f32[1,128], index: 2, kind: input, shape index: {}]   ;;  %s76_s3 = inlined_call_operand.vmem [shape: bf16[8,128], index: 3, kind: output, shape index: {}]  }
   0x1   :  { %v14_v0 = vld [vmem:[%s73_s0] sm:$0xf] }
   0x2   :  { %v39_v1 = vld [vmem:[%s74_s1] ss:$0 sm:$0xff]  ;;  %v15_v2 = vunpack.c.l.bf16 %v14_v0 }
   0x3   :  { %v40_v3 = vld [vmem:[%s75_s2] ss:$0 sm:$0xff] }
   0x4   :  { %v23_v4 = vmul.f32 %v39_v1, %v15_v2 }
   0x6   :  { %v31_v5 = vadd.f32 %v40_v3, %v23_v4 }
   0x8   :  { %v32_v6 = vmax.f32 %v31_v5, 0.0 }
   0xa   :  { %v33_v7 = vpack.c.bf16 %v32_v6, %v32_v6 }
   0xc   :  { %34 = vst [vmem:[%s76_s3] sm:$0xf] %v33_v7 }

// kernel: _lambda_.13
= control target key start
LH: loop header
LB: loop body
LE: loop exit
PB: predicated region body
PF: predicated region fallthrough
CT: control target
= control target key end

     0   :  { %vm381_vm0 = vcmask 1040384   ;;  %s636_s1 = inlined_call_operand.vmem [shape: bf16[512,128], index: 1, kind: input, shape index: {}]   ;;  %s637_s0 = inlined_call_operand.vmem [shape: bf16[8,512], index: 0, kind: input, shape index: {}]   ;;  %s638_s2 = inlined_call_operand.vmem [shape: bf16[8,128], index: 2, kind: output, shape index: {0}]   ;;  %s639_s3 = inlined_call_operand.vmem [shape: f32[1,2,128], index: 3, kind: output, shape index: {1}]  }
   0x1   :  { %v472_v0 = vld [vmem:[%s636_s1 + $0x78] sm:$0xff]   ;;  %v476_v4 = vld [vmem:[%s636_s1 + $0x70] sm:$0xff]   ;;  %v480_v8 = vld [vmem:[%s636_s1 + $0x68] sm:$0xff]  }
   0x2   :  { %v473_v1 = vld [vmem:[%s636_s1 + $0xf8] sm:$0xff]   ;;  %428 = vmatprep.subr.bf16.mxu0 %v472_v0  ;;  %v477_v5 = vld [vmem:[%s636_s1 + $0xf0] sm:$0xff]   ;;  %v481_v9 = vld [vmem:[%s636_s1 + $0xe8] sm:$0xff]  }
   0x3   :  { %v474_v2 = vld [vmem:[%s636_s1 + $0x38] sm:$0xff]   ;;  %450 = vmatprep.subr.bf16.mxu1 %v473_v1  ;;  %v478_v6 = vld [vmem:[%s636_s1 + $0x30] sm:$0xff]   ;;  %v482_v10 = vld [vmem:[%s636_s1 + $0x28] sm:$0xff]  }
   0x4   :  { %v475_v3 = vld [vmem:[%s636_s1 + $0xb8] sm:$0xff]   ;;  %429 = vmatpush3.bf16.msra.mxu0 %v474_v2  ;;  %v479_v7 = vld [vmem:[%s636_s1 + $0xb0] sm:$0xff]   ;;  %v483_v11 = vld [vmem:[%s636_s1 + $0xa8] sm:$0xff]  }
   0x5   :  { %451 = vmatpush3.bf16.msra.mxu1 %v475_v3  ;;  %430 = vmatprep.subr.bf16.mxu0 %v476_v4  ;;  %v484_v12 = vld [vmem:[%s636_s1 + $0x60] sm:$0xff]   ;;  %v488_v16 = vld [vmem:[%s636_s1 + $0x58] sm:$0xff]   ;;  %v492_v20 = vld [vmem:[%s636_s1 + $0x50] sm:$0xff]  }
   0x6   :  { %452 = vmatprep.subr.bf16.mxu1 %v477_v5  ;;  %v485_v13 = vld [vmem:[%s636_s1 + $0xe0] sm:$0xff]   ;;  %v489_v17 = vld [vmem:[%s636_s1 + $0xd8] sm:$0xff]   ;;  %v493_v21 = vld [vmem:[%s636_s1 + $0xd0] sm:$0xff]  }
   0x7   :  { %v486_v14 = vld [vmem:[%s636_s1 + $0x20] sm:$0xff]   ;;  %v490_v18 = vld [vmem:[%s636_s1 + $0x18] sm:$0xff]   ;;  %v494_v22 = vld [vmem:[%s636_s1 + $0x10] sm:$0xff]  }
   0x8   :  { %431 = vmatpush3.bf16.msra.mxu0 %v478_v6  ;;  %v487_v15 = vld [vmem:[%s636_s1 + $0xa0] sm:$0xff]   ;;  %v491_v19 = vld [vmem:[%s636_s1 + $0x98] sm:$0xff]   ;;  %v495_v23 = vld [vmem:[%s636_s1 + $0x90] sm:$0xff]  }
   0x9   :  { %453 = vmatpush3.bf16.msra.mxu1 %v479_v7  ;;  %432 = vmatprep.subr.bf16.mxu0 %v480_v8  ;;  %v496_v24 = vld [vmem:[%s636_s1 + $0x48] sm:$0xff]   ;;  %v500_v28 = vld [vmem:[%s636_s1 + $0x40] sm:$0xff]  }
   0xa   :  { %454 = vmatprep.subr.bf16.mxu1 %v481_v9  ;;  %v497_v25 = vld [vmem:[%s636_s1 + $0xc8] sm:$0xff]   ;;  %v501_v29 = vld [vmem:[%s636_s1 + $0xc0] sm:$0xff]  }
   0xb   :  { %v498_v26 = vld [vmem:[%s636_s1 + $0x8] sm:$0xff]   ;;  %v502_v30 = vld [vmem:[%s636_s1] sm:$0xff]  }
   0xc   :  { %433 = vmatpush3.bf16.msra.mxu0 %v482_v10  ;;  %v499_v27 = vld [vmem:[%s636_s1 + $0x88] sm:$0xff]   ;;  %v503_v31 = vld [vmem:[%s636_s1 + $0x80] sm:$0xff]  }
   0xd   :  { %455 = vmatpush3.bf16.msra.mxu1 %v483_v11  ;;  %434 = vmatprep.subr.bf16.mxu0 %v484_v12  ;;  %v14_v32 = vld [vmem:[%s637_s0] sm:$0xff]  ;;  %v15_v33 = vld [vmem:[%s637_s0 + $0x8] sm:$0xff] }
   0xe   :  { %456 = vmatprep.subr.bf16.mxu1 %v485_v13  ;;  %v392_v34 = vcombine.low %v14_v32, %v14_v32  ;;  %v393_v35 = vcombine.high %v14_v32, %v14_v32  ;;  %v394_v36 = vcombine.low %v15_v33, %v15_v33  ;;  %v395_v37 = vcombine.high %v15_v33, %v15_v33 }
  0x10   :  { %435 = vmatpush3.bf16.msra.mxu0 %v486_v14  ;;  %318 = vmatprep.mubr.bf16.mxu0 %v393_v35 }
  0x11   :  { %457 = vmatpush3.bf16.msra.mxu1 %v487_v15  ;;  %436 = vmatprep.subr.bf16.mxu0 %v488_v16 }
  0x12   :  { %458 = vmatprep.subr.bf16.mxu1 %v489_v17  ;;  %358 = vmatprep.mubr.bf16.mxu1 %v395_v37 }
  0x14   :  { %437 = vmatpush3.bf16.msra.mxu0 %v490_v18 }
  0x15   :  { %459 = vmatpush3.bf16.msra.mxu1 %v491_v19  ;;  %438 = vmatprep.subr.bf16.mxu0 %v492_v20 }
  0x16   :  { %460 = vmatprep.subr.bf16.mxu1 %v493_v21 }
  0x18   :  { %439 = vmatpush3.bf16.msra.mxu0 %v494_v22 }
  0x19   :  { %461 = vmatpush3.bf16.msra.mxu1 %v495_v23  ;;  %440 = vmatprep.subr.bf16.mxu0 %v496_v24 }
  0x1a   :  { %462 = vmatprep.subr.bf16.mxu1 %v497_v25 }
  0x1c   :  { %441 = vmatpush3.bf16.msra.mxu0 %v498_v26 }
  0x1d   :  { %463 = vmatpush3.bf16.msra.mxu1 %v499_v27  ;;  %442 = vmatprep.subr.bf16.mxu0 %v500_v28 }
  0x1e   :  { %464 = vmatprep.subr.bf16.mxu1 %v501_v29 }
  0x20   :  { %443 = vmatpush3.bf16.msra.mxu0 %v502_v30 }
  0x21   :  { %465 = vmatpush3.bf16.msra.mxu1 %v503_v31 }
  0x23   :  { %319 = vmatmul.mubr.bf16.vlgmr.msra.gmra.mxu0 %v392_v34 }
  0x24   :  { %359 = vmatmul.mubr.bf16.vlgmr.msra.gmra.mxu1 %v394_v36 }
  0xe3   :  { %v444_v38 = vpop.f32.mrf.mxu0 }
  0xe4   :  { %v466_v39 = vpop.f32.mrf.mxu1 }
  0xe5   :  { %v445_v40 = vpop.f32.mrf.mxu0 }
  0xe6   :  { %v467_v41 = vpop.f32.mrf.mxu1  ;;  %v446_v42 = vadd.f32 %v445_v40, %v444_v38 }
  0xe7   :  { %v468_v43 = vadd.f32 %v467_v41, %v466_v39  ;;  %v447_v44 = vpop.f32.mrf.mxu0 }
  0xe8   :  { %v469_v45 = vpop.f32.mrf.mxu1 }
  0xe9   :  { %v361_v46 = vadd.f32 %v468_v43, %v446_v42  ;;  %v448_v47 = vpop.f32.mrf.mxu0 }
  0xea   :  { %v470_v48 = vpop.f32.mrf.mxu1 }
  0xeb   :  { %v366_v49 = vpack.c.bf16 %v361_v46, %v361_v46  ;;  %v368_v50 = vrot.slane %v361_v46, 4  ;;  %v374_v51 = vmul.f32 %v361_v46, %v361_v46 }
  0xed   :  { %367 = vst [vmem:[%s638_s2] sm:$0xf] %v366_v49  ;;  %v369_v52 = vadd.f32 %v368_v50, %v361_v46  ;;  %v375_v53 = vrot.slane %v374_v51, 4 }
  0xef   :  { %v370_v54 = vrot.slane %v369_v52, 2  ;;  %v376_v55 = vadd.f32 %v375_v53, %v374_v51 }
  0xf1   :  { %v371_v56 = vadd.f32 %v370_v54, %v369_v52  ;;  %v377_v57 = vrot.slane %v376_v55, 2 }
  0xf3   :  { %v372_v58 = vrot.slane %v371_v56, 1  ;;  %v378_v59 = vadd.f32 %v377_v57, %v376_v55 }
  0xf5   :  { %v379_v60 = vrot.slane %v378_v59, 1  ;;  %v373_v61 = vadd.f32 %v372_v58, %v371_v56 }
  0xf7   :  { %v380_v62 = vadd.f32 %v379_v60, %v378_v59 }
  0xf9   :  { %v382_v63 = vsel %vm381_vm0, %v373_v61, %v380_v62 }
  0xfa   :  { %383 = vst [vmem:[%s639_s3] sm:$0x3] %v382_v63 }

// kernel: _lambda_.15
= control target key start
LH: loop header
LB: loop body
LE: loop exit
PB: predicated region body
PF: predicated region fallthrough
CT: control target
= control target key end

     0   :  { %s1176_s1 = inlined_call_operand.vmem [shape: bf16[1024,128], index: 1, kind: input, shape index: {}]   ;;  %s1177_s0 = inlined_call_operand.vmem [shape: bf16[8,1024], index: 0, kind: input, shape index: {}]   ;;  %s1178_s2 = inlined_call_operand.vmem [shape: bf16[8,128], index: 2, kind: output, shape index: {}]  }
   0x1   :  { %v882_v0 = vld [vmem:[%s1176_s1 + $0x78] sm:$0xff]   ;;  %v886_v4 = vld [vmem:[%s1176_s1 + $0x70] sm:$0xff]   ;;  %v890_v8 = vld [vmem:[%s1176_s1 + $0x68] sm:$0xff]  }
   0x2   :  { %v883_v1 = vld [vmem:[%s1176_s1 + $0xf8] sm:$0xff]   ;;  %794 = vmatprep.subr.bf16.mxu0 %v882_v0  ;;  %v887_v5 = vld [vmem:[%s1176_s1 + $0xf0] sm:$0xff]   ;;  %v891_v9 = vld [vmem:[%s1176_s1 + $0xe8] sm:$0xff]  }
   0x3   :  { %v884_v2 = vld [vmem:[%s1176_s1 + $0x38] sm:$0xff]   ;;  %816 = vmatprep.subr.bf16.mxu1 %v883_v1  ;;  %v888_v6 = vld [vmem:[%s1176_s1 + $0x30] sm:$0xff]   ;;  %v892_v10 = vld [vmem:[%s1176_s1 + $0x28] sm:$0xff]  }
   0x4   :  { %v885_v3 = vld [vmem:[%s1176_s1 + $0xb8] sm:$0xff]   ;;  %795 = vmatpush3.bf16.msra.mxu0 %v884_v2  ;;  %v889_v7 = vld [vmem:[%s1176_s1 + $0xb0] sm:$0xff]   ;;  %v893_v11 = vld [vmem:[%s1176_s1 + $0xa8] sm:$0xff]  }
   0x5   :  { %817 = vmatpush3.bf16.msra.mxu1 %v885_v3  ;;  %796 = vmatprep.subr.bf16.mxu0 %v886_v4  ;;  %v894_v12 = vld [vmem:[%s1176_s1 + $0x60] sm:$0xff]   ;;  %v898_v16 = vld [vmem:[%s1176_s1 + $0x58] sm:$0xff]   ;;  %v902_v20 = vld [vmem:[%s1176_s1 + $0x50] sm:$0xff]  }
   0x6   :  { %818 = vmatprep.subr.bf16.mxu1 %v887_v5  ;;  %v895_v13 = vld [vmem:[%s1176_s1 + $0xe0] sm:$0xff]   ;;  %v899_v17 = vld [vmem:[%s1176_s1 + $0xd8] sm:$0xff]   ;;  %v903_v21 = vld [vmem:[%s1176_s1 + $0xd0] sm:$0xff]  }
   0x7   :  { %v896_v14 = vld [vmem:[%s1176_s1 + $0x20] sm:$0xff]   ;;  %v900_v18 = vld [vmem:[%s1176_s1 + $0x18] sm:$0xff]   ;;  %v904_v22 = vld [vmem:[%s1176_s1 + $0x10] sm:$0xff]  }
   0x8   :  { %797 = vmatpush3.bf16.msra.mxu0 %v888_v6  ;;  %v897_v15 = vld [vmem:[%s1176_s1 + $0xa0] sm:$0xff]   ;;  %v901_v19 = vld [vmem:[%s1176_s1 + $0x98] sm:$0xff]   ;;  %v905_v23 = vld [vmem:[%s1176_s1 + $0x90] sm:$0xff]  }
   0x9   :  { %819 = vmatpush3.bf16.msra.mxu1 %v889_v7  ;;  %798 = vmatprep.subr.bf16.mxu0 %v890_v8  ;;  %v906_v24 = vld [vmem:[%s1176_s1 + $0x48] sm:$0xff]   ;;  %v910_v28 = vld [vmem:[%s1176_s1 + $0x40] sm:$0xff]   ;;  %v918_v38 = vld [vmem:[%s1176_s1 + $0x178] sm:$0xff]  }
   0xa   :  { %820 = vmatprep.subr.bf16.mxu1 %v891_v9  ;;  %v907_v25 = vld [vmem:[%s1176_s1 + $0xc8] sm:$0xff]   ;;  %v911_v29 = vld [vmem:[%s1176_s1 + $0xc0] sm:$0xff]   ;;  %v919_v39 = vld [vmem:[%s1176_s1 + $0x1f8] sm:$0xff]  }
   0xb   :  { %v908_v26 = vld [vmem:[%s1176_s1 + $0x8] sm:$0xff]   ;;  %v912_v30 = vld [vmem:[%s1176_s1] sm:$0xff]   ;;  %v920_v40 = vld [vmem:[%s1176_s1 + $0x138] sm:$0xff]  }
   0xc   :  { %799 = vmatpush3.bf16.msra.mxu0 %v892_v10  ;;  %v909_v27 = vld [vmem:[%s1176_s1 + $0x88] sm:$0xff]   ;;  %v913_v31 = vld [vmem:[%s1176_s1 + $0x80] sm:$0xff]   ;;  %v921_v41 = vld [vmem:[%s1176_s1 + $0x1b8] sm:$0xff]  }
   0xd   :  { %821 = vmatpush3.bf16.msra.mxu1 %v893_v11  ;;  %800 = vmatprep.subr.bf16.mxu0 %v894_v12  ;;  %v12_v32 = vld [vmem:[%s1177_s0] sm:$0xff]  ;;  %v13_v33 = vld [vmem:[%s1177_s0 + $0x8] sm:$0xff]  ;;  %v922_v42 = vld [vmem:[%s1176_s1 + $0x170] sm:$0xff]  }
   0xe   :  { %822 = vmatprep.subr.bf16.mxu1 %v895_v13  ;;  %v722_v34 = vcombine.low %v12_v32, %v12_v32  ;;  %v723_v35 = vcombine.high %v12_v32, %v12_v32  ;;  %v724_v36 = vcombine.low %v13_v33, %v13_v33  ;;  %v725_v37 = vcombine.high %v13_v33, %v13_v33  ;;  %v923_v43 = vld [vmem:[%s1176_s1 + $0x1f0] sm:$0xff]   ;;  %v926_v46 = vld [vmem:[%s1176_s1 + $0x168] sm:$0xff]   ;;  %v930_v50 = vld [vmem:[%s1176_s1 + $0x160] sm:$0xff]  }
   0xf   :  { %v924_v44 = vld [vmem:[%s1176_s1 + $0x130] sm:$0xff]   ;;  %v927_v47 = vld [vmem:[%s1176_s1 + $0x1e8] sm:$0xff]   ;;  %v931_v51 = vld [vmem:[%s1176_s1 + $0x1e0] sm:$0xff]  }
  0x10   :  { %801 = vmatpush3.bf16.msra.mxu0 %v896_v14  ;;  %588 = vmatprep.mubr.bf16.mxu0 %v723_v35  ;;  %v925_v45 = vld [vmem:[%s1176_s1 + $0x1b0] sm:$0xff]   ;;  %v928_v48 = vld [vmem:[%s1176_s1 + $0x128] sm:$0xff]   ;;  %v932_v52 = vld [vmem:[%s1176_s1 + $0x120] sm:$0xff]  }
  0x11   :  { %823 = vmatpush3.bf16.msra.mxu1 %v897_v15  ;;  %802 = vmatprep.subr.bf16.mxu0 %v898_v16  ;;  %v929_v49 = vld [vmem:[%s1176_s1 + $0x1a8] sm:$0xff]   ;;  %v933_v53 = vld [vmem:[%s1176_s1 + $0x1a0] sm:$0xff]   ;;  %v934_v54 = vld [vmem:[%s1176_s1 + $0x158] sm:$0xff]  }
  0x12   :  { %824 = vmatprep.subr.bf16.mxu1 %v899_v17  ;;  %628 = vmatprep.mubr.bf16.mxu1 %v725_v37  ;;  %v935_v55 = vld [vmem:[%s1176_s1 + $0x1d8] sm:$0xff]   ;;  %v938_v58 = vld [vmem:[%s1176_s1 + $0x150] sm:$0xff]   ;;  %v942_v62 = vld [vmem:[%s1176_s1 + $0x148] sm:$0xff]  }
  0x13   :  { %v936_v56 = vld [vmem:[%s1176_s1 + $0x118] sm:$0xff]   ;;  %v939_v59 = vld [vmem:[%s1176_s1 + $0x1d0] sm:$0xff]   ;;  %v943_v63 = vld [vmem:[%s1176_s1 + $0x1c8] sm:$0xff]  }
  0x14   :  { %803 = vmatpush3.bf16.msra.mxu0 %v900_v18  ;;  %v937_v57 = vld [vmem:[%s1176_s1 + $0x198] sm:$0xff]   ;;  %v940_v60 = vld [vmem:[%s1176_s1 + $0x110] sm:$0xff]   ;;  %v944_v0 = vld [vmem:[%s1176_s1 + $0x108] sm:$0xff]  }
  0x15   :  { %825 = vmatpush3.bf16.msra.mxu1 %v901_v19  ;;  %804 = vmatprep.subr.bf16.mxu0 %v902_v20  ;;  %v941_v61 = vld [vmem:[%s1176_s1 + $0x190] sm:$0xff]   ;;  %v945_v1 = vld [vmem:[%s1176_s1 + $0x188] sm:$0xff]   ;;  %v946_v2 = vld [vmem:[%s1176_s1 + $0x140] sm:$0xff]  }
  0x16   :  { %826 = vmatprep.subr.bf16.mxu1 %v903_v21  ;;  %v947_v3 = vld [vmem:[%s1176_s1 + $0x1c0] sm:$0xff]   ;;  %v14_v6 = vld [vmem:[%s1177_s0 + $0x10] sm:$0xff]  ;;  %v15_v9 = vld [vmem:[%s1177_s0 + $0x18] sm:$0xff] }
  0x17   :  { %v948_v4 = vld [vmem:[%s1176_s1 + $0x100] sm:$0xff]   ;;  %v726_v7 = vcombine.low %v14_v6, %v14_v6  ;;  %v727_v8 = vcombine.high %v14_v6, %v14_v6  ;;  %v728_v10 = vcombine.low %v15_v9, %v15_v9  ;;  %v729_v11 = vcombine.high %v15_v9, %v15_v9 }
  0x18   :  { %805 = vmatpush3.bf16.msra.mxu0 %v904_v22  ;;  %v949_v5 = vld [vmem:[%s1176_s1 + $0x180] sm:$0xff]  }
  0x19   :  { %827 = vmatpush3.bf16.msra.mxu1 %v905_v23  ;;  %806 = vmatprep.subr.bf16.mxu0 %v906_v24 }
  0x1a   :  { %828 = vmatprep.subr.bf16.mxu1 %v907_v25 }
  0x1c   :  { %807 = vmatpush3.bf16.msra.mxu0 %v908_v26 }
  0x1d   :  { %829 = vmatpush3.bf16.msra.mxu1 %v909_v27  ;;  %808 = vmatprep.subr.bf16.mxu0 %v910_v28 }
  0x1e   :  { %830 = vmatprep.subr.bf16.mxu1 %v911_v29 }
  0x20   :  { %809 = vmatpush3.bf16.msra.mxu0 %v912_v30 }
  0x21   :  { %831 = vmatpush3.bf16.msra.mxu1 %v913_v31  ;;  %838 = vmatprep.subr.bf16.mxu0 %v918_v38 }
  0x22   :  { %860 = vmatprep.subr.bf16.mxu1 %v919_v39 }
  0x23   :  { %589 = vmatmul.mubr.bf16.vlgmr.msra.gmra.mxu0 %v722_v34 }
  0x24   :  { %629 = vmatmul.mubr.bf16.vlgmr.msra.gmra.mxu1 %v724_v36  ;;  %839 = vmatpush3.bf16.msra.mxu0 %v920_v40 }
  0x25   :  { %861 = vmatpush3.bf16.msra.mxu1 %v921_v41  ;;  %840 = vmatprep.subr.bf16.mxu0 %v922_v42 }
  0x26   :  { %862 = vmatprep.subr.bf16.mxu1 %v923_v43  ;;  %668 = vmatprep.mubr.bf16.mxu0 %v727_v8 }
  0x27   :  { %708 = vmatprep.mubr.bf16.mxu1 %v729_v11 }
  0x28   :  { %841 = vmatpush3.bf16.msra.mxu0 %v924_v44 }
  0x29   :  { %863 = vmatpush3.bf16.msra.mxu1 %v925_v45  ;;  %842 = vmatprep.subr.bf16.mxu0 %v926_v46 }
  0x2a   :  { %864 = vmatprep.subr.bf16.mxu1 %v927_v47 }
  0x2c   :  { %843 = vmatpush3.bf16.msra.mxu0 %v928_v48 }
  0x2d   :  { %865 = vmatpush3.bf16.msra.mxu1 %v929_v49  ;;  %844 = vmatprep.subr.bf16.mxu0 %v930_v50 }
  0x2e   :  { %866 = vmatprep.subr.bf16.mxu1 %v931_v51 }
  0x30   :  { %845 = vmatpush3.bf16.msra.mxu0 %v932_v52 }
  0x31   :  { %867 = vmatpush3.bf16.msra.mxu1 %v933_v53  ;;  %846 = vmatprep.subr.bf16.mxu0 %v934_v54 }
  0x32   :  { %868 = vmatprep.subr.bf16.mxu1 %v935_v55 }
  0x34   :  { %847 = vmatpush3.bf16.msra.mxu0 %v936_v56 }
  0x35   :  { %869 = vmatpush3.bf16.msra.mxu1 %v937_v57  ;;  %848 = vmatprep.subr.bf16.mxu0 %v938_v58 }
  0x36   :  { %870 = vmatprep.subr.bf16.mxu1 %v939_v59 }
  0x38   :  { %849 = vmatpush3.bf16.msra.mxu0 %v940_v60 }
  0x39   :  { %871 = vmatpush3.bf16.msra.mxu1 %v941_v61  ;;  %850 = vmatprep.subr.bf16.mxu0 %v942_v62 }
  0x3a   :  { %872 = vmatprep.subr.bf16.mxu1 %v943_v63 }
  0x3c   :  { %851 = vmatpush3.bf16.msra.mxu0 %v944_v0 }
  0x3d   :  { %873 = vmatpush3.bf16.msra.mxu1 %v945_v1  ;;  %852 = vmatprep.subr.bf16.mxu0 %v946_v2 }
  0x3e   :  { %874 = vmatprep.subr.bf16.mxu1 %v947_v3 }
  0x40   :  { %853 = vmatpush3.bf16.msra.mxu0 %v948_v4 }
  0x41   :  { %875 = vmatpush3.bf16.msra.mxu1 %v949_v5 }
  0x43   :  { %669 = vmatmul.mubr.bf16.vlgmr.msra.gmra.mxu0 %v726_v7 }
  0x44   :  { %709 = vmatmul.mubr.bf16.vlgmr.msra.gmra.mxu1 %v728_v10 }
  0xe3   :  { %v810_v12 = vpop.f32.mrf.mxu0 }
  0xe4   :  { %v832_v13 = vpop.f32.mrf.mxu1 }
  0xe5   :  { %v811_v14 = vpop.f32.mrf.mxu0 }
  0xe6   :  { %v833_v15 = vpop.f32.mrf.mxu1  ;;  %v812_v20 = vadd.f32 %v811_v14, %v810_v12 }
  0xe7   :  { %v813_v16 = vpop.f32.mrf.mxu0  ;;  %v834_v21 = vadd.f32 %v833_v15, %v832_v13 }
  0xe8   :  { %v835_v17 = vpop.f32.mrf.mxu1 }
  0xe9   :  { %v814_v18 = vpop.f32.mrf.mxu0  ;;  %v631_v26 = vadd.f32 %v834_v21, %v812_v20 }
  0xea   :  { %v836_v19 = vpop.f32.mrf.mxu1 }
 0x103   :  { %v854_v22 = vpop.f32.mrf.mxu0 }
 0x104   :  { %v876_v23 = vpop.f32.mrf.mxu1 }
 0x105   :  { %v855_v24 = vpop.f32.mrf.mxu0 }
 0x106   :  { %v877_v25 = vpop.f32.mrf.mxu1  ;;  %v856_v27 = vadd.f32 %v855_v24, %v854_v22 }
 0x107   :  { %v857_v28 = vpop.f32.mrf.mxu0  ;;  %v878_v31 = vadd.f32 %v877_v25, %v876_v23 }
 0x108   :  { %v879_v29 = vpop.f32.mrf.mxu1  ;;  %v671_v30 = vadd.f32 %v856_v27, %v631_v26 }
 0x109   :  { %v858_v32 = vpop.f32.mrf.mxu0 }
 0x10a   :  { %v880_v33 = vpop.f32.mrf.mxu1  ;;  %v711_v34 = vadd.f32 %v878_v31, %v671_v30 }
 0x10c   :  { %v716_v35 = vpack.c.bf16 %v711_v34, %v711_v34 }
 0x10e   :  { %717 = vst [vmem:[%s1178_s2] sm:$0xf] %v716_v35 }

</bundles_post_ra>
